<compile_context>
chip_gen: v5e
topology: v5e:2x2
jax: 0.10.0
libtpu: 0.0.40
codegen_flags: <defaults>
</compile_context>

<pallas_src>
import jax
import jax.numpy as jnp
from jax.experimental import pallas as pl
from jax.experimental.pallas import tpu as pltpu


def _relu_conv1x1_kernel(x_ref, w_ref, o_ref):
    # x_ref: (C_in, tile_hw)   w_ref: (C_out, C_in)   o_ref: (C_out, tile_hw)
    x = jnp.maximum(x_ref[...], 0.0)  # fused ReLU on the VPU
    o_ref[...] = jnp.dot(
        w_ref[...], x, preferred_element_type=jnp.float32
    ).astype(o_ref.dtype)


def relu_conv1x1(x_nchw: jax.Array, w_oihw: jax.Array) -> jax.Array:
    """ReLU(x) followed by 1x1 conv (stride 1, no bias). x: NCHW, w: (C_out, C_in, 1, 1)."""
    n, c_in, h, w = x_nchw.shape
    c_out = w_oihw.shape[0]
    hw = h * w

    # Pure reshapes only -- no layout-changing transposes on either side.
    x3d = x_nchw.reshape(n, c_in, hw)      # (N, C_in, HW)
    w2d = w_oihw.reshape(c_out, c_in)      # (C_out, C_in)

    # Pixel-tile size: lane dim must be a multiple of 128 or the full extent.
    if hw % 128 == 0:
        tile_hw = min(hw, 512)
    elif hw < 128:
        tile_hw = hw
    else:
        tile_hw = 128                      # ragged tail -> padded block, masked writeback
    num_tiles = pl.cdiv(hw, tile_hw)

    itemsize = jnp.dtype(x3d.dtype).itemsize
    cost = pl.CostEstimate(
        flops=2 * n * hw * c_in * c_out,
        transcendentals=0,
        bytes_accessed=(x3d.size + w2d.size + n * c_out * hw) * itemsize,
    )

    out3d = pl.pallas_call(
        _relu_conv1x1_kernel,
        out_shape=jax.ShapeDtypeStruct((n, c_out, hw), x3d.dtype),
        grid_spec=pltpu.PrefetchScalarGridSpec(
            num_scalar_prefetch=0,
            grid=(n, num_tiles),
            in_specs=[
                # Activations: one (C_in, tile_hw) slab per (batch, pixel-tile).
                pl.BlockSpec((None, c_in, tile_hw), lambda b, j: (b, 0, j)),
                # Weights: constant index_map -> fetched once, VMEM-resident.
                pl.BlockSpec((c_out, c_in), lambda b, j: (0, 0)),
            ],
            out_specs=pl.BlockSpec((None, c_out, tile_hw), lambda b, j: (b, 0, j)),
        ),
        compiler_params=pltpu.CompilerParams(
            # Both grid axes are independent -> allow megacore sharding (v7x).
            dimension_semantics=("parallel", "parallel"),
        ),
        cost_estimate=cost,
    )(x3d, w2d)

    # (N, C_out, HW) -> NCHW, again a pure reshape.
    return out3d.reshape(n, c_out, h, w)


if __name__ == "__main__":
    key = jax.random.PRNGKey(0)
    k_x, k_w = jax.random.split(key)

    N, C_IN, H, W = 1, 1472, 14, 14
    C_OUT = 128

    x = jax.random.normal(k_x, (N, C_IN, H, W), dtype=jnp.float32)
    # Deterministic conv weight init (kaiming-ish scale), shape (C_out, C_in, 1, 1)
    w = jax.random.normal(k_w, (C_OUT, C_IN, 1, 1), dtype=jnp.float32) * (
        1.0 / jnp.sqrt(C_IN)
    )

    out = relu_conv1x1(x, w)
    out = jax.block_until_ready(out)

    # Sanity check against plain-JAX reference.
    ref = jax.lax.conv_general_dilated(
        jnp.maximum(x, 0.0),
        w,
        window_strides=(1, 1),
        padding="VALID",
        dimension_numbers=("NCHW", "OIHW", "NCHW"),
    )
    assert out.shape == (N, C_OUT, H, W), out.shape
    assert jnp.allclose(out, ref, atol=1e-4, rtol=1e-4), float(
        jnp.max(jnp.abs(out - ref))
    )

    print("KERNEL_OK")
</pallas_src>

<mosaic_0001>
module attributes {stable_mosaic.version = 11 : i64} {
  func.func @_relu_conv1x1_kernel(%arg0: i32, %arg1: i32, %arg2: memref<1x1472x128xf32, #tpu.memory_space<vmem>>, %arg3: memref<128x1472xf32, #tpu.memory_space<vmem>>, %arg4: memref<1x128x128xf32, #tpu.memory_space<vmem>>) attributes {dimension_semantics = [#tpu.dimension_semantics<parallel>, #tpu.dimension_semantics<parallel>], iteration_bounds = array<i64: 1, 2>, scalar_prefetch = 0 : i64, scratch_operands = 0 : i64, tpu.core_type = #tpu.core_type<tc>, window_params = [{transform_indices = @transform_0, window_bounds = array<i64: 1, 1472, 128>}, {pipeline_mode = #tpu.pipeline_mode<synchronous>, transform_indices = @transform_1, window_bounds = array<i64: 128, 1472>}, {transform_indices = @transform_2, window_bounds = array<i64: 1, 128, 128>}]} {
    %c0 = arith.constant 0 : index
    %c0_0 = arith.constant 0 : index
    %c0_1 = arith.constant 0 : index
    %0 = vector.load %arg2[%c0, %c0_0, %c0_1] : memref<1x1472x128xf32, #tpu.memory_space<vmem>>, vector<1x1472x128xf32>
    %1 = vector.shape_cast %0 : vector<1x1472x128xf32> to vector<1472x128xf32>
    %cst = arith.constant 0.000000e+00 : f32
    %2 = vector.broadcast %cst : f32 to vector<1472x128xf32>
    %3 = arith.maximumf %1, %2 : vector<1472x128xf32>
    %c0_2 = arith.constant 0 : index
    %c0_3 = arith.constant 0 : index
    %4 = vector.load %arg3[%c0_2, %c0_3] : memref<128x1472xf32, #tpu.memory_space<vmem>>, vector<128x1472xf32>
    %cst_4 = arith.constant dense<0.000000e+00> : vector<128x128xf32>
    %5 = tpu.matmul %4, %3, %cst_4 {dimension_numbers = #tpu.dot_dimension_numbers<[1], [0], [0], [1], [0, 0, 1, 1], [], []>} : vector<128x1472xf32>, vector<1472x128xf32>, vector<128x128xf32> -> vector<128x128xf32>
    %c0_5 = arith.constant 0 : index
    %c0_6 = arith.constant 0 : index
    %c0_7 = arith.constant 0 : index
    %6 = vector.load %arg4[%c0_5, %c0_6, %c0_7] : memref<1x128x128xf32, #tpu.memory_space<vmem>>, vector<1x128x128xf32>
    %7 = vector.shape_cast %6 : vector<1x128x128xf32> to vector<128x128xf32>
    %8 = vector.shape_cast %5 : vector<128x128xf32> to vector<1x128x128xf32>
    tpu.vector_store %arg4[%c0_5, %c0_6, %c0_7], %8 {strides = array<i32>} : memref<1x128x128xf32, #tpu.memory_space<vmem>>, vector<1x128x128xf32>,
    return
  }
  func.func @transform_0(%arg0: i32, %arg1: i32) -> (i32, i32, i32) {
    %c0_i32 = arith.constant 0 : i32
    %c0_i32_0 = arith.constant 0 : i32
    return %arg0, %c0_i32, %arg1 : i32, i32, i32
  }
  func.func @transform_1(%arg0: i32, %arg1: i32) -> (i32, i32) {
    %c0_i32 = arith.constant 0 : i32
    %c0_i32_0 = arith.constant 0 : i32
    %c0_i32_1 = arith.constant 0 : i32
    return %c0_i32, %c0_i32_0 : i32, i32
  }
  func.func @transform_2(%arg0: i32, %arg1: i32) -> (i32, i32, i32) {
    %c0_i32 = arith.constant 0 : i32
    %c0_i32_0 = arith.constant 0 : i32
    return %arg0, %c0_i32, %arg1 : i32, i32, i32
  }
}

</mosaic_0001>

<bundles_post_ra>
// kernel: tpu_custom_call.1
= control target key start
LH: loop header
LB: loop body
LE: loop exit
PB: predicated region body
PF: predicated region fallthrough
CT: control target
= control target key end

     0   :  { %s2625_s9 = smov 0   ;;  %s2627_s10 = smov 0   ;;  %s3981_s0 = inlined_call_operand.vmem [shape: f32[1,1472,196], index: 0, kind: input, shape index: {}]   ;;  %s3982_s1 = inlined_call_operand.vmem [shape: f32[128,1472], index: 1, kind: input, shape index: {}]   ;;  %s3983_s2 = inlined_call_operand.vmem [shape: f32[1,128,196], index: 2, kind: output, shape index: {}]  }
   0x1   :  { %s2629_s11 = smov 0   ;;  %s2631_s12 = smov 0  }
   0x2   :  { %s2633_s13 = smov 0  }
   0x3 LB: > { %s21_s14 = sadd.s32 1, %s2604_s12  ;;  %s2501_s15 = sadd.s32 4294967295, %s2608_s13   ;;  %s2608_s13 = sphi %s2633_s13, %s12_s13   ;;  %s2604_s12 = sphi %s2631_s12, %s3988_s12   ;;  %s2600_s11 = sphi %s2629_s11, %s3987_s11   ;;  %s2596_s10 = sphi %s2627_s10, %s3986_s10   ;;  %s2592_s9 = sphi %s2625_s9, %s3985_s9  }
   0x4   : > { %p22_p0 = scmp.ge.s32.totalorder %s21_s14, 2  ;;  %p40_p1 = scmp.ne.s32.totalorder %s2596_s10, %s2592_s9 }
   0x5   : > { %p41_p2 = scmp.eq.s32.totalorder %s2608_s13, 0  ;;  %p93_p4 = scmp.eq.s32.totalorder %s2501_s15, 1 }
   0x6   : > { %s3990_s14 = smov (%p22_p0, %s21_s14), 0  ;;  %s33_s17 = sadd.s32 1, %s2596_s10 }
   0x7   : > { %p42_p3 = por %p41_p2, %p40_p1  ;;  %s29_s16 = ssub.s32 %s2604_s12, %s3990_s14 }
   0x8   : > { %p31_p5 = scmp.eq.s32.totalorder %s29_s16, 0  ;;  %p2660_p6 = por %p93_p4, %p40_p1 }
   0x9   : > { %p2504_p7 = scmp.ge.s32.totalorder %s2608_s13, 2 }
   0xa   : > { %s2665_s19 = scalar_select %p31_p5, %s2596_s10, %s33_s17  }
   0xb   : > { %118 = sbr.rel (%p2504_p7) target bundleno = 204 (0xcc), region = 20 }
  0x10   : > { %121 = sbr.rel (!%p42_p3) target bundleno = 204 (0xcc), region = 24  ;;  %s123_s20 = sand.u32 (%p42_p3), 1, %s2596_s10  }
  0x11   : > { %s2505_s21 = sshll.u32 (%p42_p3), %s2604_s12, 3  ;;  %s2528_s22 = smul.u32 (%p42_p3), 1472, %s123_s20 }
  0x12   : > { %s2673_s25 = scalar_lea.vmem (%p42_p3), %s3981_s0, %s2505_s21 }
  0x13   : > { %v524_v0 = vld [vmem:[%s2673_s25] sm:$0xff] (%p42_p3)  ;;  %v526_v1 = vld [vmem:[%s2673_s25 + $0x10] sm:$0xff] (%p42_p3)  ;;  %s2678_s26 = scalar_lea.vmem (%p42_p3), [#allocation2], %s2528_s22 }
  0x14   : > { %v528_v2 = vld [vmem:[%s2673_s25 + $0x20] sm:$0xff] (%p42_p3)  ;;  %525 = vst [vmem:[%s2678_s26] sm:$0xff] (%p42_p3), %v524_v0  ;;  %v530_v3 = vld [vmem:[%s2673_s25 + $0x30] sm:$0xff] (%p42_p3) }
  0x15   : > { %527 = vst [vmem:[%s2678_s26 + $0x8] sm:$0xff] %v526_v1  ;;  %v532_v4 = vld [vmem:[%s2673_s25 + $0x40] sm:$0xff]  ;;  %v534_v5 = vld [vmem:[%s2673_s25 + $0x50] sm:$0xff] }
  0x16   : > { %529 = vst [vmem:[%s2678_s26 + $0x10] sm:$0xff] %v528_v2  ;;  %v536_v6 = vld [vmem:[%s2673_s25 + $0x60] sm:$0xff]  ;;  %v538_v7 = vld [vmem:[%s2673_s25 + $0x70] sm:$0xff] }
  0x17   : > { %531 = vst [vmem:[%s2678_s26 + $0x18] sm:$0xff] %v530_v3  ;;  %v540_v8 = vld [vmem:[%s2673_s25 + $0x80] sm:$0xff]  ;;  %v542_v9 = vld [vmem:[%s2673_s25 + $0x90] sm:$0xff] }
  0x18   : > { %533 = vst [vmem:[%s2678_s26 + $0x20] sm:$0xff] %v532_v4  ;;  %v544_v10 = vld [vmem:[%s2673_s25 + $0xa0] sm:$0xff]  ;;  %v546_v11 = vld [vmem:[%s2673_s25 + $0xb0] sm:$0xff] }
  0x19   : > { %535 = vst [vmem:[%s2678_s26 + $0x28] sm:$0xff] %v534_v5  ;;  %v548_v12 = vld [vmem:[%s2673_s25 + $0xc0] sm:$0xff]  ;;  %v550_v13 = vld [vmem:[%s2673_s25 + $0xd0] sm:$0xff] }
  0x1a   : > { %537 = vst [vmem:[%s2678_s26 + $0x30] sm:$0xff] %v536_v6  ;;  %v552_v14 = vld [vmem:[%s2673_s25 + $0xe0] sm:$0xff]  ;;  %v554_v15 = vld [vmem:[%s2673_s25 + $0xf0] sm:$0xff] }
  0x1b   : > { %539 = vst [vmem:[%s2678_s26 + $0x38] sm:$0xff] %v538_v7  ;;  %v556_v16 = vld [vmem:[%s2673_s25 + $0x100] sm:$0xff]  ;;  %v558_v17 = vld [vmem:[%s2673_s25 + $0x110] sm:$0xff] }
  0x1c   : > { %541 = vst [vmem:[%s2678_s26 + $0x40] sm:$0xff] %v540_v8  ;;  %v560_v18 = vld [vmem:[%s2673_s25 + $0x120] sm:$0xff]  ;;  %v562_v19 = vld [vmem:[%s2673_s25 + $0x130] sm:$0xff] }
  0x1d   : > { %543 = vst [vmem:[%s2678_s26 + $0x48] sm:$0xff] %v542_v9  ;;  %v564_v20 = vld [vmem:[%s2673_s25 + $0x140] sm:$0xff]  ;;  %v566_v21 = vld [vmem:[%s2673_s25 + $0x150] sm:$0xff] }
  0x1e   : > { %545 = vst [vmem:[%s2678_s26 + $0x50] sm:$0xff] %v544_v10  ;;  %v568_v22 = vld [vmem:[%s2673_s25 + $0x160] sm:$0xff]  ;;  %v570_v23 = vld [vmem:[%s2673_s25 + $0x170] sm:$0xff] }
  0x1f   : > { %547 = vst [vmem:[%s2678_s26 + $0x58] sm:$0xff] %v546_v11  ;;  %v572_v24 = vld [vmem:[%s2673_s25 + $0x180] sm:$0xff]  ;;  %v574_v25 = vld [vmem:[%s2673_s25 + $0x190] sm:$0xff] }
  0x20   : > { %549 = vst [vmem:[%s2678_s26 + $0x60] sm:$0xff] %v548_v12  ;;  %v576_v26 = vld [vmem:[%s2673_s25 + $0x1a0] sm:$0xff]  ;;  %v578_v27 = vld [vmem:[%s2673_s25 + $0x1b0] sm:$0xff] }
  0x21   : > { %551 = vst [vmem:[%s2678_s26 + $0x68] sm:$0xff] %v550_v13  ;;  %v580_v28 = vld [vmem:[%s2673_s25 + $0x1c0] sm:$0xff]  ;;  %v582_v29 = vld [vmem:[%s2673_s25 + $0x1d0] sm:$0xff] }
  0x22   : > { %553 = vst [vmem:[%s2678_s26 + $0x70] sm:$0xff] %v552_v14  ;;  %v584_v30 = vld [vmem:[%s2673_s25 + $0x1e0] sm:$0xff]  ;;  %v586_v31 = vld [vmem:[%s2673_s25 + $0x1f0] sm:$0xff] }
  0x23   : > { %555 = vst [vmem:[%s2678_s26 + $0x78] sm:$0xff] %v554_v15  ;;  %v588_v32 = vld [vmem:[%s2673_s25 + $0x200] sm:$0xff]  ;;  %v590_v33 = vld [vmem:[%s2673_s25 + $0x210] sm:$0xff] }
  0x24   : > { %557 = vst [vmem:[%s2678_s26 + $0x80] sm:$0xff] %v556_v16  ;;  %v592_v34 = vld [vmem:[%s2673_s25 + $0x220] sm:$0xff]  ;;  %v594_v35 = vld [vmem:[%s2673_s25 + $0x230] sm:$0xff] }
  0x25   : > { %559 = vst [vmem:[%s2678_s26 + $0x88] sm:$0xff] %v558_v17  ;;  %v596_v36 = vld [vmem:[%s2673_s25 + $0x240] sm:$0xff]  ;;  %v598_v37 = vld [vmem:[%s2673_s25 + $0x250] sm:$0xff] }
  0x26   : > { %561 = vst [vmem:[%s2678_s26 + $0x90] sm:$0xff] %v560_v18  ;;  %v600_v38 = vld [vmem:[%s2673_s25 + $0x260] sm:$0xff]  ;;  %v602_v39 = vld [vmem:[%s2673_s25 + $0x270] sm:$0xff] }
  0x27   : > { %563 = vst [vmem:[%s2678_s26 + $0x98] sm:$0xff] %v562_v19  ;;  %v604_v40 = vld [vmem:[%s2673_s25 + $0x280] sm:$0xff]  ;;  %v606_v41 = vld [vmem:[%s2673_s25 + $0x290] sm:$0xff] }
  0x28   : > { %565 = vst [vmem:[%s2678_s26 + $0xa0] sm:$0xff] %v564_v20  ;;  %v608_v42 = vld [vmem:[%s2673_s25 + $0x2a0] sm:$0xff]  ;;  %v610_v43 = vld [vmem:[%s2673_s25 + $0x2b0] sm:$0xff] }
  0x29   : > { %567 = vst [vmem:[%s2678_s26 + $0xa8] sm:$0xff] %v566_v21  ;;  %v612_v44 = vld [vmem:[%s2673_s25 + $0x2c0] sm:$0xff]  ;;  %v614_v45 = vld [vmem:[%s2673_s25 + $0x2d0] sm:$0xff] }
  0x2a   : > { %569 = vst [vmem:[%s2678_s26 + $0xb0] sm:$0xff] %v568_v22  ;;  %v616_v46 = vld [vmem:[%s2673_s25 + $0x2e0] sm:$0xff]  ;;  %v618_v47 = vld [vmem:[%s2673_s25 + $0x2f0] sm:$0xff] }
  0x2b   : > { %571 = vst [vmem:[%s2678_s26 + $0xb8] sm:$0xff] %v570_v23  ;;  %v620_v48 = vld [vmem:[%s2673_s25 + $0x300] sm:$0xff]  ;;  %v622_v49 = vld [vmem:[%s2673_s25 + $0x310] sm:$0xff] }
  0x2c   : > { %573 = vst [vmem:[%s2678_s26 + $0xc0] sm:$0xff] %v572_v24  ;;  %v624_v50 = vld [vmem:[%s2673_s25 + $0x320] sm:$0xff]  ;;  %v626_v51 = vld [vmem:[%s2673_s25 + $0x330] sm:$0xff] }
  0x2d   : > { %575 = vst [vmem:[%s2678_s26 + $0xc8] sm:$0xff] %v574_v25  ;;  %v628_v52 = vld [vmem:[%s2673_s25 + $0x340] sm:$0xff]  ;;  %v630_v53 = vld [vmem:[%s2673_s25 + $0x350] sm:$0xff] }
  0x2e   : > { %577 = vst [vmem:[%s2678_s26 + $0xd0] sm:$0xff] %v576_v26  ;;  %v632_v54 = vld [vmem:[%s2673_s25 + $0x360] sm:$0xff]  ;;  %v634_v55 = vld [vmem:[%s2673_s25 + $0x370] sm:$0xff] }
  0x2f   : > { %579 = vst [vmem:[%s2678_s26 + $0xd8] sm:$0xff] %v578_v27  ;;  %v636_v56 = vld [vmem:[%s2673_s25 + $0x380] sm:$0xff]  ;;  %v638_v57 = vld [vmem:[%s2673_s25 + $0x390] sm:$0xff] }
  0x30   : > { %581 = vst [vmem:[%s2678_s26 + $0xe0] sm:$0xff] %v580_v28  ;;  %v640_v58 = vld [vmem:[%s2673_s25 + $0x3a0] sm:$0xff]  ;;  %v642_v59 = vld [vmem:[%s2673_s25 + $0x3b0] sm:$0xff] }
  0x31   : > { %583 = vst [vmem:[%s2678_s26 + $0xe8] sm:$0xff] %v582_v29  ;;  %v644_v60 = vld [vmem:[%s2673_s25 + $0x3c0] sm:$0xff]  ;;  %v646_v61 = vld [vmem:[%s2673_s25 + $0x3d0] sm:$0xff] }
  0x32   : > { %585 = vst [vmem:[%s2678_s26 + $0xf0] sm:$0xff] %v584_v30  ;;  %v648_v62 = vld [vmem:[%s2673_s25 + $0x3e0] sm:$0xff]  ;;  %v650_v63 = vld [vmem:[%s2673_s25 + $0x3f0] sm:$0xff] }
  0x33   : > { %587 = vst [vmem:[%s2678_s26 + $0xf8] sm:$0xff] %v586_v31  ;;  %v652_v0 = vld [vmem:[%s2673_s25 + $0x400] sm:$0xff]  ;;  %v654_v1 = vld [vmem:[%s2673_s25 + $0x410] sm:$0xff] }
  0x34   : > { %589 = vst [vmem:[%s2678_s26 + $0x100] sm:$0xff] %v588_v32  ;;  %v656_v2 = vld [vmem:[%s2673_s25 + $0x420] sm:$0xff]  ;;  %v658_v3 = vld [vmem:[%s2673_s25 + $0x430] sm:$0xff] }
  0x35   : > { %591 = vst [vmem:[%s2678_s26 + $0x108] sm:$0xff] %v590_v33  ;;  %v660_v4 = vld [vmem:[%s2673_s25 + $0x440] sm:$0xff]  ;;  %v662_v5 = vld [vmem:[%s2673_s25 + $0x450] sm:$0xff] }
  0x36   : > { %593 = vst [vmem:[%s2678_s26 + $0x110] sm:$0xff] %v592_v34  ;;  %v664_v6 = vld [vmem:[%s2673_s25 + $0x460] sm:$0xff]  ;;  %v666_v7 = vld [vmem:[%s2673_s25 + $0x470] sm:$0xff] }
  0x37   : > { %595 = vst [vmem:[%s2678_s26 + $0x118] sm:$0xff] %v594_v35  ;;  %v668_v8 = vld [vmem:[%s2673_s25 + $0x480] sm:$0xff]  ;;  %v670_v9 = vld [vmem:[%s2673_s25 + $0x490] sm:$0xff] }
  0x38   : > { %597 = vst [vmem:[%s2678_s26 + $0x120] sm:$0xff] %v596_v36  ;;  %v672_v10 = vld [vmem:[%s2673_s25 + $0x4a0] sm:$0xff]  ;;  %v674_v11 = vld [vmem:[%s2673_s25 + $0x4b0] sm:$0xff] }
  0x39   : > { %599 = vst [vmem:[%s2678_s26 + $0x128] sm:$0xff] %v598_v37  ;;  %v676_v12 = vld [vmem:[%s2673_s25 + $0x4c0] sm:$0xff]  ;;  %v678_v13 = vld [vmem:[%s2673_s25 + $0x4d0] sm:$0xff] }
  0x3a   : > { %601 = vst [vmem:[%s2678_s26 + $0x130] sm:$0xff] %v600_v38  ;;  %v680_v14 = vld [vmem:[%s2673_s25 + $0x4e0] sm:$0xff]  ;;  %v682_v15 = vld [vmem:[%s2673_s25 + $0x4f0] sm:$0xff] }
  0x3b   : > { %603 = vst [vmem:[%s2678_s26 + $0x138] sm:$0xff] %v602_v39  ;;  %v684_v16 = vld [vmem:[%s2673_s25 + $0x500] sm:$0xff]  ;;  %v686_v17 = vld [vmem:[%s2673_s25 + $0x510] sm:$0xff] }
  0x3c   : > { %605 = vst [vmem:[%s2678_s26 + $0x140] sm:$0xff] %v604_v40  ;;  %v688_v18 = vld [vmem:[%s2673_s25 + $0x520] sm:$0xff]  ;;  %v690_v19 = vld [vmem:[%s2673_s25 + $0x530] sm:$0xff] }
  0x3d   : > { %607 = vst [vmem:[%s2678_s26 + $0x148] sm:$0xff] %v606_v41  ;;  %v692_v20 = vld [vmem:[%s2673_s25 + $0x540] sm:$0xff]  ;;  %v694_v21 = vld [vmem:[%s2673_s25 + $0x550] sm:$0xff] }
  0x3e   : > { %609 = vst [vmem:[%s2678_s26 + $0x150] sm:$0xff] %v608_v42  ;;  %v696_v22 = vld [vmem:[%s2673_s25 + $0x560] sm:$0xff]  ;;  %v698_v23 = vld [vmem:[%s2673_s25 + $0x570] sm:$0xff] }
  0x3f   : > { %611 = vst [vmem:[%s2678_s26 + $0x158] sm:$0xff] %v610_v43  ;;  %v700_v24 = vld [vmem:[%s2673_s25 + $0x580] sm:$0xff]  ;;  %v702_v25 = vld [vmem:[%s2673_s25 + $0x590] sm:$0xff] }
  0x40   : > { %613 = vst [vmem:[%s2678_s26 + $0x160] sm:$0xff] %v612_v44  ;;  %v704_v26 = vld [vmem:[%s2673_s25 + $0x5a0] sm:$0xff]  ;;  %v706_v27 = vld [vmem:[%s2673_s25 + $0x5b0] sm:$0xff] }
  0x41   : > { %615 = vst [vmem:[%s2678_s26 + $0x168] sm:$0xff] %v614_v45  ;;  %v708_v28 = vld [vmem:[%s2673_s25 + $0x5c0] sm:$0xff]  ;;  %v710_v29 = vld [vmem:[%s2673_s25 + $0x5d0] sm:$0xff] }
  0x42   : > { %617 = vst [vmem:[%s2678_s26 + $0x170] sm:$0xff] %v616_v46  ;;  %v712_v30 = vld [vmem:[%s2673_s25 + $0x5e0] sm:$0xff]  ;;  %v714_v31 = vld [vmem:[%s2673_s25 + $0x5f0] sm:$0xff] }
  0x43   : > { %619 = vst [vmem:[%s2678_s26 + $0x178] sm:$0xff] %v618_v47  ;;  %v716_v32 = vld [vmem:[%s2673_s25 + $0x600] sm:$0xff]  ;;  %v718_v33 = vld [vmem:[%s2673_s25 + $0x610] sm:$0xff] }
  0x44   : > { %621 = vst [vmem:[%s2678_s26 + $0x180] sm:$0xff] %v620_v48  ;;  %v720_v34 = vld [vmem:[%s2673_s25 + $0x620] sm:$0xff]  ;;  %v722_v35 = vld [vmem:[%s2673_s25 + $0x630] sm:$0xff] }
  0x45   : > { %623 = vst [vmem:[%s2678_s26 + $0x188] sm:$0xff] %v622_v49  ;;  %v724_v36 = vld [vmem:[%s2673_s25 + $0x640] sm:$0xff]  ;;  %v726_v37 = vld [vmem:[%s2673_s25 + $0x650] sm:$0xff] }
  0x46   : > { %625 = vst [vmem:[%s2678_s26 + $0x190] sm:$0xff] %v624_v50  ;;  %v728_v38 = vld [vmem:[%s2673_s25 + $0x660] sm:$0xff]  ;;  %v730_v39 = vld [vmem:[%s2673_s25 + $0x670] sm:$0xff] }
  0x47   : > { %627 = vst [vmem:[%s2678_s26 + $0x198] sm:$0xff] %v626_v51  ;;  %v732_v40 = vld [vmem:[%s2673_s25 + $0x680] sm:$0xff]  ;;  %v734_v41 = vld [vmem:[%s2673_s25 + $0x690] sm:$0xff] }
  0x48   : > { %629 = vst [vmem:[%s2678_s26 + $0x1a0] sm:$0xff] %v628_v52  ;;  %v736_v42 = vld [vmem:[%s2673_s25 + $0x6a0] sm:$0xff]  ;;  %v738_v43 = vld [vmem:[%s2673_s25 + $0x6b0] sm:$0xff] }
  0x49   : > { %631 = vst [vmem:[%s2678_s26 + $0x1a8] sm:$0xff] %v630_v53  ;;  %v740_v44 = vld [vmem:[%s2673_s25 + $0x6c0] sm:$0xff]  ;;  %v742_v45 = vld [vmem:[%s2673_s25 + $0x6d0] sm:$0xff] }
  0x4a   : > { %633 = vst [vmem:[%s2678_s26 + $0x1b0] sm:$0xff] %v632_v54  ;;  %v744_v46 = vld [vmem:[%s2673_s25 + $0x6e0] sm:$0xff]  ;;  %v746_v47 = vld [vmem:[%s2673_s25 + $0x6f0] sm:$0xff] }
  0x4b   : > { %635 = vst [vmem:[%s2678_s26 + $0x1b8] sm:$0xff] %v634_v55  ;;  %v748_v48 = vld [vmem:[%s2673_s25 + $0x700] sm:$0xff]  ;;  %v750_v49 = vld [vmem:[%s2673_s25 + $0x710] sm:$0xff] }
  0x4c   : > { %637 = vst [vmem:[%s2678_s26 + $0x1c0] sm:$0xff] %v636_v56  ;;  %v752_v50 = vld [vmem:[%s2673_s25 + $0x720] sm:$0xff]  ;;  %v754_v51 = vld [vmem:[%s2673_s25 + $0x730] sm:$0xff] }
  0x4d   : > { %639 = vst [vmem:[%s2678_s26 + $0x1c8] sm:$0xff] %v638_v57  ;;  %v756_v52 = vld [vmem:[%s2673_s25 + $0x740] sm:$0xff]  ;;  %v758_v53 = vld [vmem:[%s2673_s25 + $0x750] sm:$0xff] }
  0x4e   : > { %641 = vst [vmem:[%s2678_s26 + $0x1d0] sm:$0xff] %v640_v58  ;;  %v760_v54 = vld [vmem:[%s2673_s25 + $0x760] sm:$0xff]  ;;  %v762_v55 = vld [vmem:[%s2673_s25 + $0x770] sm:$0xff] }
  0x4f   : > { %643 = vst [vmem:[%s2678_s26 + $0x1d8] sm:$0xff] %v642_v59  ;;  %v764_v56 = vld [vmem:[%s2673_s25 + $0x780] sm:$0xff]  ;;  %v766_v57 = vld [vmem:[%s2673_s25 + $0x790] sm:$0xff] }
  0x50   : > { %645 = vst [vmem:[%s2678_s26 + $0x1e0] sm:$0xff] %v644_v60  ;;  %v768_v58 = vld [vmem:[%s2673_s25 + $0x7a0] sm:$0xff]  ;;  %v770_v59 = vld [vmem:[%s2673_s25 + $0x7b0] sm:$0xff] }
  0x51   : > { %647 = vst [vmem:[%s2678_s26 + $0x1e8] sm:$0xff] %v646_v61  ;;  %v772_v60 = vld [vmem:[%s2673_s25 + $0x7c0] sm:$0xff]  ;;  %v774_v61 = vld [vmem:[%s2673_s25 + $0x7d0] sm:$0xff] }
  0x52   : > { %649 = vst [vmem:[%s2678_s26 + $0x1f0] sm:$0xff] %v648_v62  ;;  %v776_v62 = vld [vmem:[%s2673_s25 + $0x7e0] sm:$0xff] }
  0x53   : > { %651 = vst [vmem:[%s2678_s26 + $0x1f8] sm:$0xff] %v650_v63  ;;  %v778_v63 = vld [vmem:[%s2673_s25 + $0x7f0] sm:$0xff] }
  0x54   : > { %653 = vst [vmem:[%s2678_s26 + $0x200] sm:$0xff] %v652_v0  ;;  %v780_v0 = vld [vmem:[%s2673_s25 + $0x800] sm:$0xff] }
  0x55   : > { %655 = vst [vmem:[%s2678_s26 + $0x208] sm:$0xff] %v654_v1  ;;  %v782_v1 = vld [vmem:[%s2673_s25 + $0x810] sm:$0xff] }
  0x56   : > { %657 = vst [vmem:[%s2678_s26 + $0x210] sm:$0xff] %v656_v2  ;;  %v784_v2 = vld [vmem:[%s2673_s25 + $0x820] sm:$0xff] }
  0x57   : > { %659 = vst [vmem:[%s2678_s26 + $0x218] sm:$0xff] %v658_v3  ;;  %v786_v3 = vld [vmem:[%s2673_s25 + $0x830] sm:$0xff] }
  0x58   : > { %661 = vst [vmem:[%s2678_s26 + $0x220] sm:$0xff] %v660_v4  ;;  %v788_v4 = vld [vmem:[%s2673_s25 + $0x840] sm:$0xff] }
  0x59   : > { %663 = vst [vmem:[%s2678_s26 + $0x228] sm:$0xff] %v662_v5  ;;  %v790_v5 = vld [vmem:[%s2673_s25 + $0x850] sm:$0xff] }
  0x5a   : > { %665 = vst [vmem:[%s2678_s26 + $0x230] sm:$0xff] %v664_v6  ;;  %v792_v6 = vld [vmem:[%s2673_s25 + $0x860] sm:$0xff] }
  0x5b   : > { %667 = vst [vmem:[%s2678_s26 + $0x238] sm:$0xff] %v666_v7  ;;  %v794_v7 = vld [vmem:[%s2673_s25 + $0x870] sm:$0xff] }
  0x5c   : > { %669 = vst [vmem:[%s2678_s26 + $0x240] sm:$0xff] %v668_v8  ;;  %v796_v8 = vld [vmem:[%s2673_s25 + $0x880] sm:$0xff] }
  0x5d   : > { %671 = vst [vmem:[%s2678_s26 + $0x248] sm:$0xff] %v670_v9  ;;  %v798_v9 = vld [vmem:[%s2673_s25 + $0x890] sm:$0xff] }
  0x5e   : > { %673 = vst [vmem:[%s2678_s26 + $0x250] sm:$0xff] %v672_v10  ;;  %v800_v10 = vld [vmem:[%s2673_s25 + $0x8a0] sm:$0xff] }
  0x5f   : > { %675 = vst [vmem:[%s2678_s26 + $0x258] sm:$0xff] %v674_v11  ;;  %v802_v11 = vld [vmem:[%s2673_s25 + $0x8b0] sm:$0xff] }
  0x60   : > { %677 = vst [vmem:[%s2678_s26 + $0x260] sm:$0xff] %v676_v12  ;;  %v804_v12 = vld [vmem:[%s2673_s25 + $0x8c0] sm:$0xff] }
  0x61   : > { %679 = vst [vmem:[%s2678_s26 + $0x268] sm:$0xff] %v678_v13  ;;  %v806_v13 = vld [vmem:[%s2673_s25 + $0x8d0] sm:$0xff] }
  0x62   : > { %681 = vst [vmem:[%s2678_s26 + $0x270] sm:$0xff] %v680_v14  ;;  %v808_v14 = vld [vmem:[%s2673_s25 + $0x8e0] sm:$0xff] }
  0x63   : > { %683 = vst [vmem:[%s2678_s26 + $0x278] sm:$0xff] %v682_v15  ;;  %v810_v15 = vld [vmem:[%s2673_s25 + $0x8f0] sm:$0xff] }
  0x64   : > { %685 = vst [vmem:[%s2678_s26 + $0x280] sm:$0xff] %v684_v16  ;;  %v812_v16 = vld [vmem:[%s2673_s25 + $0x900] sm:$0xff] }
  0x65   : > { %687 = vst [vmem:[%s2678_s26 + $0x288] sm:$0xff] %v686_v17  ;;  %v814_v17 = vld [vmem:[%s2673_s25 + $0x910] sm:$0xff] }
  0x66   : > { %689 = vst [vmem:[%s2678_s26 + $0x290] sm:$0xff] %v688_v18  ;;  %v816_v18 = vld [vmem:[%s2673_s25 + $0x920] sm:$0xff] }
  0x67   : > { %691 = vst [vmem:[%s2678_s26 + $0x298] sm:$0xff] %v690_v19  ;;  %v818_v19 = vld [vmem:[%s2673_s25 + $0x930] sm:$0xff] }
  0x68   : > { %693 = vst [vmem:[%s2678_s26 + $0x2a0] sm:$0xff] %v692_v20  ;;  %v820_v20 = vld [vmem:[%s2673_s25 + $0x940] sm:$0xff] }
  0x69   : > { %695 = vst [vmem:[%s2678_s26 + $0x2a8] sm:$0xff] %v694_v21  ;;  %v822_v21 = vld [vmem:[%s2673_s25 + $0x950] sm:$0xff] }
  0x6a   : > { %697 = vst [vmem:[%s2678_s26 + $0x2b0] sm:$0xff] %v696_v22  ;;  %v824_v22 = vld [vmem:[%s2673_s25 + $0x960] sm:$0xff] }
  0x6b   : > { %699 = vst [vmem:[%s2678_s26 + $0x2b8] sm:$0xff] %v698_v23  ;;  %v826_v23 = vld [vmem:[%s2673_s25 + $0x970] sm:$0xff] }
  0x6c   : > { %701 = vst [vmem:[%s2678_s26 + $0x2c0] sm:$0xff] %v700_v24  ;;  %v828_v24 = vld [vmem:[%s2673_s25 + $0x980] sm:$0xff] }
  0x6d   : > { %703 = vst [vmem:[%s2678_s26 + $0x2c8] sm:$0xff] %v702_v25  ;;  %v830_v25 = vld [vmem:[%s2673_s25 + $0x990] sm:$0xff] }
  0x6e   : > { %705 = vst [vmem:[%s2678_s26 + $0x2d0] sm:$0xff] %v704_v26  ;;  %v832_v26 = vld [vmem:[%s2673_s25 + $0x9a0] sm:$0xff] }
  0x6f   : > { %707 = vst [vmem:[%s2678_s26 + $0x2d8] sm:$0xff] %v706_v27  ;;  %v834_v27 = vld [vmem:[%s2673_s25 + $0x9b0] sm:$0xff] }
  0x70   : > { %709 = vst [vmem:[%s2678_s26 + $0x2e0] sm:$0xff] %v708_v28  ;;  %v836_v28 = vld [vmem:[%s2673_s25 + $0x9c0] sm:$0xff] }
  0x71   : > { %711 = vst [vmem:[%s2678_s26 + $0x2e8] sm:$0xff] %v710_v29  ;;  %v838_v29 = vld [vmem:[%s2673_s25 + $0x9d0] sm:$0xff] }
  0x72   : > { %713 = vst [vmem:[%s2678_s26 + $0x2f0] sm:$0xff] %v712_v30  ;;  %v840_v30 = vld [vmem:[%s2673_s25 + $0x9e0] sm:$0xff] }
  0x73   : > { %715 = vst [vmem:[%s2678_s26 + $0x2f8] sm:$0xff] %v714_v31  ;;  %v842_v31 = vld [vmem:[%s2673_s25 + $0x9f0] sm:$0xff] }
  0x74   : > { %717 = vst [vmem:[%s2678_s26 + $0x300] sm:$0xff] %v716_v32  ;;  %v844_v32 = vld [vmem:[%s2673_s25 + $0xa00] sm:$0xff] }
  0x75   : > { %719 = vst [vmem:[%s2678_s26 + $0x308] sm:$0xff] %v718_v33  ;;  %v846_v33 = vld [vmem:[%s2673_s25 + $0xa10] sm:$0xff] }
  0x76   : > { %721 = vst [vmem:[%s2678_s26 + $0x310] sm:$0xff] %v720_v34  ;;  %v848_v34 = vld [vmem:[%s2673_s25 + $0xa20] sm:$0xff] }
  0x77   : > { %723 = vst [vmem:[%s2678_s26 + $0x318] sm:$0xff] %v722_v35  ;;  %v850_v35 = vld [vmem:[%s2673_s25 + $0xa30] sm:$0xff] }
  0x78   : > { %725 = vst [vmem:[%s2678_s26 + $0x320] sm:$0xff] %v724_v36  ;;  %v852_v36 = vld [vmem:[%s2673_s25 + $0xa40] sm:$0xff] }
  0x79   : > { %727 = vst [vmem:[%s2678_s26 + $0x328] sm:$0xff] %v726_v37  ;;  %v854_v37 = vld [vmem:[%s2673_s25 + $0xa50] sm:$0xff] }
  0x7a   : > { %729 = vst [vmem:[%s2678_s26 + $0x330] sm:$0xff] %v728_v38  ;;  %v856_v38 = vld [vmem:[%s2673_s25 + $0xa60] sm:$0xff] }
  0x7b   : > { %731 = vst [vmem:[%s2678_s26 + $0x338] sm:$0xff] %v730_v39  ;;  %v858_v39 = vld [vmem:[%s2673_s25 + $0xa70] sm:$0xff] }
  0x7c   : > { %733 = vst [vmem:[%s2678_s26 + $0x340] sm:$0xff] %v732_v40  ;;  %v860_v40 = vld [vmem:[%s2673_s25 + $0xa80] sm:$0xff] }
  0x7d   : > { %735 = vst [vmem:[%s2678_s26 + $0x348] sm:$0xff] %v734_v41  ;;  %v862_v41 = vld [vmem:[%s2673_s25 + $0xa90] sm:$0xff] }
  0x7e   : > { %737 = vst [vmem:[%s2678_s26 + $0x350] sm:$0xff] %v736_v42  ;;  %v864_v42 = vld [vmem:[%s2673_s25 + $0xaa0] sm:$0xff] }
  0x7f   : > { %739 = vst [vmem:[%s2678_s26 + $0x358] sm:$0xff] %v738_v43  ;;  %v866_v43 = vld [vmem:[%s2673_s25 + $0xab0] sm:$0xff] }
  0x80   : > { %741 = vst [vmem:[%s2678_s26 + $0x360] sm:$0xff] %v740_v44  ;;  %v868_v44 = vld [vmem:[%s2673_s25 + $0xac0] sm:$0xff] }
  0x81   : > { %743 = vst [vmem:[%s2678_s26 + $0x368] sm:$0xff] %v742_v45  ;;  %v870_v45 = vld [vmem:[%s2673_s25 + $0xad0] sm:$0xff] }
  0x82   : > { %745 = vst [vmem:[%s2678_s26 + $0x370] sm:$0xff] %v744_v46  ;;  %v872_v46 = vld [vmem:[%s2673_s25 + $0xae0] sm:$0xff] }
  0x83   : > { %747 = vst [vmem:[%s2678_s26 + $0x378] sm:$0xff] %v746_v47  ;;  %v874_v47 = vld [vmem:[%s2673_s25 + $0xaf0] sm:$0xff] }
  0x84   : > { %749 = vst [vmem:[%s2678_s26 + $0x380] sm:$0xff] %v748_v48  ;;  %v876_v48 = vld [vmem:[%s2673_s25 + $0xb00] sm:$0xff] }
  0x85   : > { %751 = vst [vmem:[%s2678_s26 + $0x388] sm:$0xff] %v750_v49  ;;  %v878_v49 = vld [vmem:[%s2673_s25 + $0xb10] sm:$0xff] }
  0x86   : > { %753 = vst [vmem:[%s2678_s26 + $0x390] sm:$0xff] %v752_v50  ;;  %v880_v50 = vld [vmem:[%s2673_s25 + $0xb20] sm:$0xff] }
  0x87   : > { %755 = vst [vmem:[%s2678_s26 + $0x398] sm:$0xff] %v754_v51  ;;  %v882_v51 = vld [vmem:[%s2673_s25 + $0xb30] sm:$0xff] }
  0x88   : > { %757 = vst [vmem:[%s2678_s26 + $0x3a0] sm:$0xff] %v756_v52  ;;  %v884_v52 = vld [vmem:[%s2673_s25 + $0xb40] sm:$0xff] }
  0x89   : > { %759 = vst [vmem:[%s2678_s26 + $0x3a8] sm:$0xff] %v758_v53  ;;  %v886_v53 = vld [vmem:[%s2673_s25 + $0xb50] sm:$0xff] }
  0x8a   : > { %761 = vst [vmem:[%s2678_s26 + $0x3b0] sm:$0xff] %v760_v54  ;;  %v888_v54 = vld [vmem:[%s2673_s25 + $0xb60] sm:$0xff] }
  0x8b   : > { %763 = vst [vmem:[%s2678_s26 + $0x3b8] sm:$0xff] %v762_v55  ;;  %v890_v55 = vld [vmem:[%s2673_s25 + $0xb70] sm:$0xff] }
  0x8c   : > { %765 = vst [vmem:[%s2678_s26 + $0x3c0] sm:$0xff] %v764_v56 }
  0x8d   : > { %767 = vst [vmem:[%s2678_s26 + $0x3c8] sm:$0xff] %v766_v57 }
  0x8e   : > { %769 = vst [vmem:[%s2678_s26 + $0x3d0] sm:$0xff] %v768_v58 }
  0x8f   : > { %771 = vst [vmem:[%s2678_s26 + $0x3d8] sm:$0xff] %v770_v59 }
  0x90   : > { %773 = vst [vmem:[%s2678_s26 + $0x3e0] sm:$0xff] %v772_v60 }
  0x91   : > { %775 = vst [vmem:[%s2678_s26 + $0x3e8] sm:$0xff] %v774_v61 }
  0x92   : > { %777 = vst [vmem:[%s2678_s26 + $0x3f0] sm:$0xff] %v776_v62 }
  0x93   : > { %779 = vst [vmem:[%s2678_s26 + $0x3f8] sm:$0xff] %v778_v63 }
  0x94   : > { %781 = vst [vmem:[%s2678_s26 + $0x400] sm:$0xff] %v780_v0 }
  0x95   : > { %783 = vst [vmem:[%s2678_s26 + $0x408] sm:$0xff] %v782_v1 }
  0x96   : > { %785 = vst [vmem:[%s2678_s26 + $0x410] sm:$0xff] %v784_v2 }
  0x97   : > { %787 = vst [vmem:[%s2678_s26 + $0x418] sm:$0xff] %v786_v3 }
  0x98   : > { %789 = vst [vmem:[%s2678_s26 + $0x420] sm:$0xff] %v788_v4 }
  0x99   : > { %791 = vst [vmem:[%s2678_s26 + $0x428] sm:$0xff] %v790_v5 }
  0x9a   : > { %793 = vst [vmem:[%s2678_s26 + $0x430] sm:$0xff] %v792_v6 }
  0x9b   : > { %795 = vst [vmem:[%s2678_s26 + $0x438] sm:$0xff] %v794_v7 }
  0x9c   : > { %797 = vst [vmem:[%s2678_s26 + $0x440] sm:$0xff] %v796_v8 }
  0x9d   : > { %799 = vst [vmem:[%s2678_s26 + $0x448] sm:$0xff] %v798_v9 }
  0x9e   : > { %801 = vst [vmem:[%s2678_s26 + $0x450] sm:$0xff] %v800_v10 }
  0x9f   : > { %803 = vst [vmem:[%s2678_s26 + $0x458] sm:$0xff] %v802_v11 }
  0xa0   : > { %805 = vst [vmem:[%s2678_s26 + $0x460] sm:$0xff] %v804_v12 }
  0xa1   : > { %807 = vst [vmem:[%s2678_s26 + $0x468] sm:$0xff] %v806_v13 }
  0xa2   : > { %809 = vst [vmem:[%s2678_s26 + $0x470] sm:$0xff] %v808_v14 }
  0xa3   : > { %811 = vst [vmem:[%s2678_s26 + $0x478] sm:$0xff] %v810_v15 }
  0xa4   : > { %813 = vst [vmem:[%s2678_s26 + $0x480] sm:$0xff] %v812_v16 }
  0xa5   : > { %815 = vst [vmem:[%s2678_s26 + $0x488] sm:$0xff] %v814_v17 }
  0xa6   : > { %817 = vst [vmem:[%s2678_s26 + $0x490] sm:$0xff] %v816_v18 }
  0xa7   : > { %819 = vst [vmem:[%s2678_s26 + $0x498] sm:$0xff] %v818_v19 }
  0xa8   : > { %821 = vst [vmem:[%s2678_s26 + $0x4a0] sm:$0xff] %v820_v20 }
  0xa9   : > { %823 = vst [vmem:[%s2678_s26 + $0x4a8] sm:$0xff] %v822_v21 }
  0xaa   : > { %825 = vst [vmem:[%s2678_s26 + $0x4b0] sm:$0xff] %v824_v22 }
  0xab   : > { %827 = vst [vmem:[%s2678_s26 + $0x4b8] sm:$0xff] %v826_v23 }
  0xac   : > { %829 = vst [vmem:[%s2678_s26 + $0x4c0] sm:$0xff] %v828_v24 }
  0xad   : > { %831 = vst [vmem:[%s2678_s26 + $0x4c8] sm:$0xff] %v830_v25 }
  0xae   : > { %833 = vst [vmem:[%s2678_s26 + $0x4d0] sm:$0xff] %v832_v26 }
  0xaf   : > { %835 = vst [vmem:[%s2678_s26 + $0x4d8] sm:$0xff] %v834_v27 }
  0xb0   : > { %837 = vst [vmem:[%s2678_s26 + $0x4e0] sm:$0xff] %v836_v28 }
  0xb1   : > { %839 = vst [vmem:[%s2678_s26 + $0x4e8] sm:$0xff] %v838_v29 }
  0xb2   : > { %841 = vst [vmem:[%s2678_s26 + $0x4f0] sm:$0xff] %v840_v30 }
  0xb3   : > { %843 = vst [vmem:[%s2678_s26 + $0x4f8] sm:$0xff] %v842_v31 }
  0xb4   : > { %845 = vst [vmem:[%s2678_s26 + $0x500] sm:$0xff] %v844_v32 }
  0xb5   : > { %847 = vst [vmem:[%s2678_s26 + $0x508] sm:$0xff] %v846_v33 }
  0xb6   : > { %849 = vst [vmem:[%s2678_s26 + $0x510] sm:$0xff] %v848_v34 }
  0xb7   : > { %851 = vst [vmem:[%s2678_s26 + $0x518] sm:$0xff] %v850_v35 }
  0xb8   : > { %853 = vst [vmem:[%s2678_s26 + $0x520] sm:$0xff] %v852_v36 }
  0xb9   : > { %855 = vst [vmem:[%s2678_s26 + $0x528] sm:$0xff] %v854_v37 }
  0xba   : > { %857 = vst [vmem:[%s2678_s26 + $0x530] sm:$0xff] %v856_v38 }
  0xbb   : > { %859 = vst [vmem:[%s2678_s26 + $0x538] sm:$0xff] %v858_v39 }
  0xbc   : > { %861 = vst [vmem:[%s2678_s26 + $0x540] sm:$0xff] %v860_v40 }
  0xbd   : > { %863 = vst [vmem:[%s2678_s26 + $0x548] sm:$0xff] %v862_v41 }
  0xbe   : > { %865 = vst [vmem:[%s2678_s26 + $0x550] sm:$0xff] %v864_v42 }
  0xbf   : > { %867 = vst [vmem:[%s2678_s26 + $0x558] sm:$0xff] %v866_v43 }
  0xc0   : > { %869 = vst [vmem:[%s2678_s26 + $0x560] sm:$0xff] %v868_v44 }
  0xc1   : > { %871 = vst [vmem:[%s2678_s26 + $0x568] sm:$0xff] %v870_v45 }
  0xc2   : > { %873 = vst [vmem:[%s2678_s26 + $0x570] sm:$0xff] %v872_v46 }
  0xc3   : > { %875 = vst [vmem:[%s2678_s26 + $0x578] sm:$0xff] %v874_v47 }
  0xc4   : > { %877 = vst [vmem:[%s2678_s26 + $0x580] sm:$0xff] %v876_v48 }
  0xc5   : > { %879 = vst [vmem:[%s2678_s26 + $0x588] sm:$0xff] %v878_v49 }
  0xc6   : > { %881 = vst [vmem:[%s2678_s26 + $0x590] sm:$0xff] %v880_v50 }
  0xc7   : > { %883 = vst [vmem:[%s2678_s26 + $0x598] sm:$0xff] %v882_v51 }
  0xc8   : > { %885 = vst [vmem:[%s2678_s26 + $0x5a0] sm:$0xff] %v884_v52 }
  0xc9   : > { %887 = vst [vmem:[%s2678_s26 + $0x5a8] sm:$0xff] %v886_v53 }
  0xca   : > { %889 = vst [vmem:[%s2678_s26 + $0x5b0] sm:$0xff] %v888_v54 }
  0xcb   : > { %891 = vst [vmem:[%s2678_s26 + $0x5b8] sm:$0xff] %v890_v55 }
  0xcc PF: > { %p2506_p8 = scmp.ge.s32.totalorder %s2608_s13, 1  ;;  %p896_p9 = scmp.lt.s32.totalorder %s2608_s13, 3 }
  0xce   : > { %p897_p10 = pnand %p2506_p8, %p896_p9 }
  0xcf   : > { %s903_s27 = sand.u32 (!%p897_p10), 1, %s2592_s9  }
  0xd0   : > { %900 = sbr.rel (%p897_p10) target bundleno = 770 (0x302), region = 62  ;;  %s2507_s25 = sshll.u32 (!%p897_p10), %s903_s27, 7 }
  0xd1   : > { %s2529_s28 = smul.u32 (!%p897_p10), 1472, %s903_s27  ;;  %s3912_s26 = scalar_lea.vmem (!%p897_p10), [#allocation3], %s2507_s25 }
  0xd3   : > { %s3050_s29 = scalar_lea.vmem (!%p897_p10), [#allocation2], %s2529_s28 }
  0xd5   : > { %v938_v56 = vld [vmem:[%s3050_s29 + $0x78] sm:$0xff]  ;;  %v937_v58 = vld [vmem:[%s3050_s29 + $0x70] sm:$0xff]  ;;  %v936_v4 = vld [vmem:[%s3050_s29 + $0x68] sm:$0xff]  ;;  %vm1483_vm0 = vcmask 523264   ;;  %s2525_s9 = sshll.u32 (%p2660_p6), %s2600_s11, 3 }
  0xd6   : > { %v970_v57 = vld [vmem:[%s3050_s29 + $0x178] sm:$0xff]  ;;  %v1122_v59 = vmax.f32 %v938_v56, 0.0  ;;  %v1121_v61 = vmax.f32 %v937_v58, 0.0  ;;  %v969_v63 = vld [vmem:[%s3050_s29 + $0x170] sm:$0xff]  ;;  %v968_v6 = vld [vmem:[%s3050_s29 + $0x168] sm:$0xff]  ;;  %v1120_v7 = vmax.f32 %v936_v4, 0.0  ;;  %s2338_s30 = scalar_lea.vmem (%p2660_p6), %s3983_s2, %s2525_s9 }
  0xd7   : > { %v1154_v60 = vmax.f32 %v970_v57, 0.0  ;;  %v954_v62 = vld [vmem:[%s3050_s29 + $0xf8] sm:$0xff]  ;;  %v1153_v2 = vmax.f32 %v969_v63, 0.0  ;;  %v953_v5 = vld [vmem:[%s3050_s29 + $0xf0] sm:$0xff]  ;;  %v1152_v9 = vmax.f32 %v968_v6, 0.0  ;;  %v935_v11 = vld [vmem:[%s3050_s29 + $0x60] sm:$0xff] }
  0xd8   : > { %v986_v0 = vld [vmem:[%s3050_s29 + $0x1f8] sm:$0xff]  ;;  %v1138_v1 = vmax.f32 %v954_v62, 0.0  ;;  %1532 = vmatpush.msra.mxu0 %v1122_v59  ;;  %v1137_v8 = vmax.f32 %v953_v5, 0.0  ;;  %v985_v10 = vld [vmem:[%s3050_s29 + $0x1f0] sm:$0xff]  ;;  %v952_v12 = vld [vmem:[%s3050_s29 + $0xe8] sm:$0xff]  ;;  %v1119_v18 = vmax.f32 %v935_v11, 0.0 }
  0xd9   : > { %v1170_v3 = vmax.f32 %v986_v0, 0.0  ;;  %1662 = vmatpush.msra.mxu2 %v1154_v60  ;;  %v1169_v13 = vmax.f32 %v985_v10, 0.0  ;;  %v1136_v14 = vmax.f32 %v952_v12, 0.0  ;;  %v967_v15 = vld [vmem:[%s3050_s29 + $0x160] sm:$0xff]  ;;  %v984_v16 = vld [vmem:[%s3050_s29 + $0x1e8] sm:$0xff]  ;;  %v934_v17 = vld [vmem:[%s3050_s29 + $0x58] sm:$0xff] }
  0xda   : > { %1597 = vmatpush.msra.mxu1 %v1138_v1  ;;  %1533 = vmatpush.msra.mxu0 %v1121_v61  ;;  %v1151_v19 = vmax.f32 %v967_v15, 0.0  ;;  %v1168_v20 = vmax.f32 %v984_v16, 0.0  ;;  %v951_v21 = vld [vmem:[%s3050_s29 + $0xe0] sm:$0xff]  ;;  %v966_v22 = vld [vmem:[%s3050_s29 + $0x158] sm:$0xff]  ;;  %v933_v26 = vld [vmem:[%s3050_s29 + $0x50] sm:$0xff]  ;;  %v1118_v29 = vmax.f32 %v934_v17, 0.0 }
  0xdb   : > { %1727 = vmatpush.msra.mxu3 %v1170_v3  ;;  %1663 = vmatpush.msra.mxu2 %v1153_v2  ;;  %v983_v23 = vld [vmem:[%s3050_s29 + $0x1e0] sm:$0xff]  ;;  %v1135_v24 = vmax.f32 %v951_v21, 0.0  ;;  %v950_v27 = vld [vmem:[%s3050_s29 + $0xd8] sm:$0xff]  ;;  %v965_v28 = vld [vmem:[%s3050_s29 + $0x150] sm:$0xff]  ;;  %v1150_v30 = vmax.f32 %v966_v22, 0.0  ;;  %v1117_v38 = vmax.f32 %v933_v26, 0.0 }
  0xdc   : > { %1598 = vmatpush.msra.mxu1 %v1137_v8  ;;  %v1167_v25 = vmax.f32 %v983_v23, 0.0  ;;  %1534 = vmatpush.msra.mxu0 %v1120_v7  ;;  %v982_v31 = vld [vmem:[%s3050_s29 + $0x1d8] sm:$0xff]  ;;  %v949_v32 = vld [vmem:[%s3050_s29 + $0xd0] sm:$0xff]  ;;  %v1134_v33 = vmax.f32 %v950_v27, 0.0  ;;  %v932_v35 = vld [vmem:[%s3050_s29 + $0x48] sm:$0xff]  ;;  %v1149_v39 = vmax.f32 %v965_v28, 0.0 }
  0xdd   : > { %1728 = vmatpush.msra.mxu3 %v1169_v13  ;;  %1664 = vmatpush.msra.mxu2 %v1152_v9  ;;  %v1166_v34 = vmax.f32 %v982_v31, 0.0  ;;  %v964_v36 = vld [vmem:[%s3050_s29 + $0x148] sm:$0xff]  ;;  %v981_v37 = vld [vmem:[%s3050_s29 + $0x1d0] sm:$0xff]  ;;  %v1133_v42 = vmax.f32 %v949_v32, 0.0  ;;  %v931_v44 = vld [vmem:[%s3050_s29 + $0x40] sm:$0xff]  ;;  %v1116_v46 = vmax.f32 %v932_v35, 0.0 }
  0xde   : > { %1599 = vmatpush.msra.mxu1 %v1136_v14  ;;  %1535 = vmatpush.msra.mxu0 %v1119_v18  ;;  %v948_v40 = vld [vmem:[%s3050_s29 + $0xc8] sm:$0xff]  ;;  %v1165_v43 = vmax.f32 %v981_v37, 0.0  ;;  %v963_v45 = vld [vmem:[%s3050_s29 + $0x140] sm:$0xff]  ;;  %v1148_v47 = vmax.f32 %v964_v36, 0.0  ;;  %v930_v52 = vld [vmem:[%s3050_s29 + $0x38] sm:$0xff]  ;;  %v1115_v54 = vmax.f32 %v931_v44, 0.0 }
  0xdf   : > { %1729 = vmatpush.msra.mxu3 %v1168_v20  ;;  %1665 = vmatpush.msra.mxu2 %v1151_v19  ;;  %v980_v41 = vld [vmem:[%s3050_s29 + $0x1c8] sm:$0xff]  ;;  %v947_v48 = vld [vmem:[%s3050_s29 + $0xc0] sm:$0xff]  ;;  %v1132_v50 = vmax.f32 %v948_v40, 0.0  ;;  %v962_v53 = vld [vmem:[%s3050_s29 + $0x138] sm:$0xff]  ;;  %v1147_v55 = vmax.f32 %v963_v45, 0.0  ;;  %v1114_v62 = vmax.f32 %v930_v52, 0.0 }
  0xe0   : > { %1600 = vmatpush.msra.mxu1 %v1135_v24  ;;  %1536 = vmatpush.msra.mxu0 %v1118_v29  ;;  %v979_v49 = vld [vmem:[%s3050_s29 + $0x1c0] sm:$0xff]  ;;  %v1164_v51 = vmax.f32 %v980_v41, 0.0  ;;  %v946_v56 = vld [vmem:[%s3050_s29 + $0xb8] sm:$0xff]  ;;  %v1131_v58 = vmax.f32 %v947_v48, 0.0  ;;  %v929_v60 = vld [vmem:[%s3050_s29 + $0x30] sm:$0xff]  ;;  %v1146_v63 = vmax.f32 %v962_v53, 0.0 }
  0xe1   : > { %1730 = vmatpush.msra.mxu3 %v1167_v25  ;;  %1666 = vmatpush.msra.mxu2 %v1150_v30  ;;  %v978_v57 = vld [vmem:[%s3050_s29 + $0x1b8] sm:$0xff]  ;;  %v1163_v59 = vmax.f32 %v979_v49, 0.0  ;;  %v961_v61 = vld [vmem:[%s3050_s29 + $0x130] sm:$0xff]  ;;  %v1130_v2 = vmax.f32 %v946_v56, 0.0  ;;  %v928_v4 = vld [vmem:[%s3050_s29 + $0x28] sm:$0xff]  ;;  %v1113_v6 = vmax.f32 %v929_v60, 0.0 }
  0xe2   : > { %1601 = vmatpush.msra.mxu1 %v1134_v33  ;;  %1537 = vmatpush.msra.mxu0 %v1117_v38  ;;  %v945_v0 = vld [vmem:[%s3050_s29 + $0xb0] sm:$0xff]  ;;  %v1162_v3 = vmax.f32 %v978_v57, 0.0  ;;  %v960_v5 = vld [vmem:[%s3050_s29 + $0x128] sm:$0xff]  ;;  %v1145_v7 = vmax.f32 %v961_v61, 0.0  ;;  %v927_v12 = vld [vmem:[%s3050_s29 + $0x20] sm:$0xff]  ;;  %v1112_v14 = vmax.f32 %v928_v4, 0.0 }
  0xe3   : > { %1731 = vmatpush.msra.mxu3 %v1166_v34  ;;  %1667 = vmatpush.msra.mxu2 %v1149_v39  ;;  %v977_v1 = vld [vmem:[%s3050_s29 + $0x1b0] sm:$0xff]  ;;  %v944_v8 = vld [vmem:[%s3050_s29 + $0xa8] sm:$0xff]  ;;  %v1129_v10 = vmax.f32 %v945_v0, 0.0  ;;  %v959_v13 = vld [vmem:[%s3050_s29 + $0x120] sm:$0xff]  ;;  %v1144_v15 = vmax.f32 %v960_v5, 0.0  ;;  %v1111_v22 = vmax.f32 %v927_v12, 0.0 }
  0xe4   : > { %1602 = vmatpush.msra.mxu1 %v1133_v42  ;;  %1538 = vmatpush.msra.mxu0 %v1116_v46  ;;  %v976_v9 = vld [vmem:[%s3050_s29 + $0x1a8] sm:$0xff]  ;;  %v1161_v11 = vmax.f32 %v977_v1, 0.0  ;;  %v943_v16 = vld [vmem:[%s3050_s29 + $0xa0] sm:$0xff]  ;;  %v1128_v18 = vmax.f32 %v944_v8, 0.0  ;;  %v926_v20 = vld [vmem:[%s3050_s29 + $0x18] sm:$0xff]  ;;  %v1143_v23 = vmax.f32 %v959_v13, 0.0 }
  0xe5   : > { %1732 = vmatpush.msra.mxu3 %v1165_v43  ;;  %1668 = vmatpush.msra.mxu2 %v1148_v47  ;;  %v975_v17 = vld [vmem:[%s3050_s29 + $0x1a0] sm:$0xff]  ;;  %v1160_v19 = vmax.f32 %v976_v9, 0.0  ;;  %v958_v21 = vld [vmem:[%s3050_s29 + $0x118] sm:$0xff]  ;;  %v1127_v26 = vmax.f32 %v943_v16, 0.0  ;;  %v925_v28 = vld [vmem:[%s3050_s29 + $0x10] sm:$0xff]  ;;  %v1110_v30 = vmax.f32 %v926_v20, 0.0 }
  0xe6   : > { %1603 = vmatpush.msra.mxu1 %v1132_v50  ;;  %1539 = vmatpush.msra.mxu0 %v1115_v54  ;;  %v942_v24 = vld [vmem:[%s3050_s29 + $0x98] sm:$0xff]  ;;  %v1159_v27 = vmax.f32 %v975_v17, 0.0  ;;  %v957_v29 = vld [vmem:[%s3050_s29 + $0x110] sm:$0xff]  ;;  %v1142_v31 = vmax.f32 %v958_v21, 0.0  ;;  %v924_v36 = vld [vmem:[%s3050_s29 + $0x8] sm:$0xff]  ;;  %v1109_v38 = vmax.f32 %v925_v28, 0.0 }
  0xe7   : > { %1733 = vmatpush.msra.mxu3 %v1164_v51  ;;  %1669 = vmatpush.msra.mxu2 %v1147_v55  ;;  %v974_v25 = vld [vmem:[%s3050_s29 + $0x198] sm:$0xff]  ;;  %v941_v32 = vld [vmem:[%s3050_s29 + $0x90] sm:$0xff]  ;;  %v1126_v34 = vmax.f32 %v942_v24, 0.0  ;;  %v956_v37 = vld [vmem:[%s3050_s29 + $0x108] sm:$0xff]  ;;  %v1141_v39 = vmax.f32 %v957_v29, 0.0  ;;  %v1108_v46 = vmax.f32 %v924_v36, 0.0 }
  0xe8   : > { %1604 = vmatpush.msra.mxu1 %v1131_v58  ;;  %1540 = vmatpush.msra.mxu0 %v1114_v62  ;;  %v973_v33 = vld [vmem:[%s3050_s29 + $0x190] sm:$0xff]  ;;  %v1158_v35 = vmax.f32 %v974_v25, 0.0  ;;  %v940_v40 = vld [vmem:[%s3050_s29 + $0x88] sm:$0xff]  ;;  %v1125_v42 = vmax.f32 %v941_v32, 0.0  ;;  %v923_v44 = vld [vmem:[%s3050_s29] sm:$0xff]  ;;  %v1140_v47 = vmax.f32 %v956_v37, 0.0 }
  0xe9   : > { %1734 = vmatpush.msra.mxu3 %v1163_v59  ;;  %1670 = vmatpush.msra.mxu2 %v1146_v63  ;;  %v972_v41 = vld [vmem:[%s3050_s29 + $0x188] sm:$0xff]  ;;  %v1157_v43 = vmax.f32 %v973_v33, 0.0  ;;  %v955_v45 = vld [vmem:[%s3050_s29 + $0x100] sm:$0xff]  ;;  %v1124_v48 = vmax.f32 %v940_v40, 0.0  ;;  %v1034_v50 = vld [vmem:[%s3050_s29 + $0x378] sm:$0xff]  ;;  %v1107_v52 = vmax.f32 %v923_v44, 0.0 }
  0xea   : > { %1605 = vmatpush.msra.mxu1 %v1130_v2  ;;  %1541 = vmatpush.msra.mxu0 %v1113_v6  ;;  %v1156_v49 = vmax.f32 %v972_v41, 0.0  ;;  %v939_v51 = vld [vmem:[%s3050_s29 + $0x80] sm:$0xff]  ;;  %v1139_v53 = vmax.f32 %v955_v45, 0.0  ;;  %v1002_v56 = vld [vmem:[%s3050_s29 + $0x278] sm:$0xff]  ;;  %v1293_v57 = vld [vmem:[%s3982_s1 + $0x10] sm:$0xff]  ;;  %v1218_v58 = vmax.f32 %v1034_v50, 0.0 }
  0xeb   : > { %1735 = vmatpush.msra.mxu3 %v1162_v3  ;;  %1671 = vmatpush.msra.mxu2 %v1145_v7  ;;  %v971_v54 = vld [vmem:[%s3050_s29 + $0x180] sm:$0xff]  ;;  %v1123_v59 = vmax.f32 %v939_v51, 0.0  ;;  %v1050_v60 = vld [vmem:[%s3050_s29 + $0x3f8] sm:$0xff]  ;;  %v1033_v63 = vld [vmem:[%s3050_s29 + $0x370] sm:$0xff]  ;;  %v1186_v2 = vmax.f32 %v1002_v56, 0.0 }
  0xec   : > { %1606 = vmatpush.msra.mxu1 %v1129_v10  ;;  %1542 = vmatpush.msra.mxu0 %v1112_v14  ;;  %v1291_v55 = vld [vmem:[%s3982_s1] sm:$0xff]  ;;  %v1018_v61 = vld [vmem:[%s3050_s29 + $0x2f8] sm:$0xff]  ;;  %v1155_v62 = vmax.f32 %v971_v54, 0.0  ;;  %v1001_v0 = vld [vmem:[%s3050_s29 + $0x270] sm:$0xff]  ;;  %v1234_v6 = vmax.f32 %v1050_v60, 0.0  ;;  %v1217_v10 = vmax.f32 %v1033_v63, 0.0 }
  0xed   : > { %1736 = vmatpush.msra.mxu3 %v1161_v11  ;;  %1672 = vmatpush.msra.mxu2 %v1144_v15  ;;  %v1292_v1 = vld [vmem:[%s3982_s1 + $0x8] sm:$0xff]  ;;  %v1049_v3 = vld [vmem:[%s3050_s29 + $0x3f0] sm:$0xff]  ;;  %v1294_v5 = vld [vmem:[%s3982_s1 + $0x18] sm:$0xff]  ;;  %v1202_v7 = vmax.f32 %v1018_v61, 0.0  ;;  %v1185_v11 = vmax.f32 %v1001_v0, 0.0 }
  0xee   : > { %1607 = vmatpush.msra.mxu1 %v1128_v18  ;;  %1543 = vmatpush.msra.mxu0 %v1111_v22  ;;  %v1017_v4 = vld [vmem:[%s3050_s29 + $0x2f0] sm:$0xff]  ;;  %v1032_v8 = vld [vmem:[%s3050_s29 + $0x368] sm:$0xff]  ;;  %v1233_v12 = vmax.f32 %v1049_v3, 0.0  ;;  %v1031_v18 = vld [vmem:[%s3050_s29 + $0x360] sm:$0xff] }
  0xef   : > { %1737 = vmatpush.msra.mxu3 %v1160_v19  ;;  %1673 = vmatpush.msra.mxu2 %v1143_v23  ;;  %v1000_v9 = vld [vmem:[%s3050_s29 + $0x268] sm:$0xff]  ;;  %v1201_v13 = vmax.f32 %v1017_v4, 0.0  ;;  %v1216_v16 = vmax.f32 %v1032_v8, 0.0  ;;  %v1303_v19 = vld [vmem:[%s3982_s1 + $0x60] sm:$0xff]  ;;  %v1305_v21 = vld [vmem:[%s3982_s1 + $0x70] sm:$0xff] }
  0xf0   : > { %1608 = vmatpush.msra.mxu1 %v1127_v26  ;;  %1544 = vmatpush.msra.mxu0 %v1110_v30  ;;  %v1048_v14 = vld [vmem:[%s3050_s29 + $0x3e8] sm:$0xff]  ;;  %v1184_v17 = vmax.f32 %v1000_v9, 0.0  ;;  %v999_v20 = vld [vmem:[%s3050_s29 + $0x260] sm:$0xff]  ;;  %v1215_v26 = vmax.f32 %v1031_v18, 0.0  ;;  %v998_v28 = vld [vmem:[%s3050_s29 + $0x258] sm:$0xff] }
  0xf1   : > { %1738 = vmatpush.msra.mxu3 %v1159_v27  ;;  %1674 = vmatpush.msra.mxu2 %v1142_v31  ;;  %v1016_v15 = vld [vmem:[%s3050_s29 + $0x2e8] sm:$0xff]  ;;  %v1232_v22 = vmax.f32 %v1048_v14, 0.0  ;;  %v1047_v24 = vld [vmem:[%s3050_s29 + $0x3e0] sm:$0xff]  ;;  %v1030_v27 = vld [vmem:[%s3050_s29 + $0x358] sm:$0xff]  ;;  %v1183_v30 = vmax.f32 %v999_v20, 0.0 }
  0xf2   : > { %1609 = vmatpush.msra.mxu1 %v1126_v34  ;;  %1545 = vmatpush.msra.mxu0 %v1109_v38  ;;  %v1200_v23 = vmax.f32 %v1016_v15, 0.0  ;;  %v1015_v25 = vld [vmem:[%s3050_s29 + $0x2e0] sm:$0xff]  ;;  %v1304_v29 = vld [vmem:[%s3982_s1 + $0x68] sm:$0xff]  ;;  %v1046_v31 = vld [vmem:[%s3050_s29 + $0x3d8] sm:$0xff]  ;;  %v1231_v34 = vmax.f32 %v1047_v24, 0.0  ;;  %v1214_v37 = vmax.f32 %v1030_v27, 0.0 }
  0xf3   : > { %1739 = vmatpush.msra.mxu3 %v1158_v35  ;;  %1675 = vmatpush.msra.mxu2 %v1141_v39  ;;  %v1014_v32 = vld [vmem:[%s3050_s29 + $0x2d8] sm:$0xff]  ;;  %v1199_v35 = vmax.f32 %v1015_v25, 0.0  ;;  %v1029_v36 = vld [vmem:[%s3050_s29 + $0x350] sm:$0xff]  ;;  %v1182_v38 = vmax.f32 %v998_v28, 0.0  ;;  %v1230_v39 = vmax.f32 %v1046_v31, 0.0  ;;  %v1316_v50 = vld [vmem:[%s3982_s1 + $0xc8] sm:$0xff] }
  0xf4   : > { %1610 = vmatpush.msra.mxu1 %v1125_v42  ;;  %1546 = vmatpush.msra.mxu0 %v1108_v46  ;;  %v1306_v33 = vld [vmem:[%s3982_s1 + $0x78] sm:$0xff]  ;;  %v1198_v40 = vmax.f32 %v1014_v32, 0.0  ;;  %v1213_v41 = vmax.f32 %v1029_v36, 0.0  ;;  %v997_v42 = vld [vmem:[%s3050_s29 + $0x250] sm:$0xff]  ;;  %v1315_v46 = vld [vmem:[%s3982_s1 + $0xc0] sm:$0xff] }
  0xf5   : > { %1740 = vmatpush.msra.mxu3 %v1157_v43  ;;  %1676 = vmatpush.msra.mxu2 %v1140_v47  ;;  %v1045_v43 = vld [vmem:[%s3050_s29 + $0x3d0] sm:$0xff]  ;;  %v1181_v45 = vmax.f32 %v997_v42, 0.0  ;;  %v1318_v51 = vld [vmem:[%s3982_s1 + $0xd8] sm:$0xff]  ;;  %v996_v54 = vld [vmem:[%s3050_s29 + $0x248] sm:$0xff] }
  0xf6   : > { %1611 = vmatpush.msra.mxu1 %v1124_v48  ;;  %1547 = vmatpush.msra.mxu0 %v1107_v52  ;;  %v1013_v44 = vld [vmem:[%s3050_s29 + $0x2d0] sm:$0xff]  ;;  %v1229_v48 = vmax.f32 %v1045_v43, 0.0  ;;  %v1028_v52 = vld [vmem:[%s3050_s29 + $0x348] sm:$0xff]  ;;  %v1327_v60 = vld [vmem:[%s3982_s1 + $0x120] sm:$0xff] }
  0xf7   : > { %1741 = vmatpush.msra.mxu3 %v1156_v49  ;;  %1677 = vmatpush.msra.mxu2 %v1139_v53  ;;  %v1317_v47 = vld [vmem:[%s3982_s1 + $0xd0] sm:$0xff]  ;;  %v1197_v49 = vmax.f32 %v1013_v44, 0.0  ;;  %v1212_v53 = vmax.f32 %v1028_v52, 0.0  ;;  %v1012_v56 = vld [vmem:[%s3050_s29 + $0x2c8] sm:$0xff]  ;;  %v1330_v63 = vld [vmem:[%s3982_s1 + $0x138] sm:$0xff] }
  0xf8   : > { %1548 = vmatmul.f32.vlgmr.msra.gmra.mxu0 %v1291_v55  ;;  %1678 = vmatmul.f32.vlgmr.msra.gmra.mxu2 %v1293_v57  ;;  %v1044_v55 = vld [vmem:[%s3050_s29 + $0x3c8] sm:$0xff]  ;;  %v1180_v57 = vmax.f32 %v996_v54, 0.0  ;;  %v1329_v61 = vld [vmem:[%s3982_s1 + $0x130] sm:$0xff]  ;;  %v1027_v0 = vld [vmem:[%s3050_s29 + $0x340] sm:$0xff] }
  0xf9   : > { %1922 = vmatpush.msrb.mxu2 %v1218_v58  ;;  %1612 = vmatpush.msra.mxu1 %v1123_v59  ;;  %v1228_v58 = vmax.f32 %v1044_v55, 0.0  ;;  %v1196_v59 = vmax.f32 %v1012_v56, 0.0  ;;  %v1043_v3 = vld [vmem:[%s3050_s29 + $0x3c0] sm:$0xff]  ;;  %v1341_v9 = vld [vmem:[%s3982_s1 + $0x190] sm:$0xff]  ;;  %v994_v14 = vld [vmem:[%s3050_s29 + $0x238] sm:$0xff] }
  0xfa   : > { %1742 = vmatpush.msra.mxu3 %v1155_v62  ;;  %1613 = vmatmul.f32.vlgmr.msra.gmra.mxu1 %v1292_v1  ;;  %v1328_v62 = vld [vmem:[%s3982_s1 + $0x128] sm:$0xff]  ;;  %v1211_v1 = vmax.f32 %v1027_v0, 0.0  ;;  %v1011_v4 = vld [vmem:[%s3050_s29 + $0x2c0] sm:$0xff]  ;;  %v1042_v15 = vld [vmem:[%s3050_s29 + $0x3b8] sm:$0xff] }
  0xfb   : > { %1743 = vmatmul.f32.vlgmr.msra.gmra.mxu3 %v1294_v5  ;;  %1792 = vmatpush.msrb.mxu0 %v1186_v2  ;;  %v995_v2 = vld [vmem:[%s3050_s29 + $0x240] sm:$0xff]  ;;  %v1226_v18 = vmax.f32 %v1042_v15, 0.0  ;;  %v1025_v24 = vld [vmem:[%s3050_s29 + $0x330] sm:$0xff]  ;;  %v1024_v36 = vld [vmem:[%s3050_s29 + $0x328] sm:$0xff] }
  0xfc   : > { %1987 = vmatpush.msrb.mxu3 %v1234_v6  ;;  %1857 = vmatpush.msrb.mxu1 %v1202_v7  ;;  %v1179_v5 = vmax.f32 %v995_v2, 0.0  ;;  %v1227_v6 = vmax.f32 %v1043_v3, 0.0  ;;  %v1195_v7 = vmax.f32 %v1011_v4, 0.0  ;;  %v1339_v8 = vld [vmem:[%s3982_s1 + $0x180] sm:$0xff]  ;;  %v1209_v25 = vmax.f32 %v1025_v24, 0.0  ;;  %v1041_v27 = vld [vmem:[%s3050_s29 + $0x3b0] sm:$0xff] }
  0xfd   : > { %1923 = vmatpush.msrb.mxu2 %v1217_v10  ;;  %1793 = vmatpush.msrb.mxu0 %v1185_v11  ;;  %v1340_v10 = vld [vmem:[%s3982_s1 + $0x188] sm:$0xff]  ;;  %v1342_v11 = vld [vmem:[%s3982_s1 + $0x198] sm:$0xff]  ;;  %v1351_v20 = vld [vmem:[%s3982_s1 + $0x1e0] sm:$0xff] }
  0xfe   : > { %1988 = vmatpush.msrb.mxu3 %v1233_v12  ;;  %1858 = vmatpush.msrb.mxu1 %v1201_v13  ;;  %v1026_v12 = vld [vmem:[%s3050_s29 + $0x338] sm:$0xff]  ;;  %v1009_v28 = vld [vmem:[%s3050_s29 + $0x2b0] sm:$0xff]  ;;  %v1363_v32 = vld [vmem:[%s3982_s1 + $0x240] sm:$0xff] }
  0xff   : > { %1924 = vmatpush.msrb.mxu2 %v1216_v16  ;;  %1794 = vmatpush.msrb.mxu0 %v1184_v17  ;;  %v1210_v13 = vmax.f32 %v1026_v12, 0.0  ;;  %v1010_v16 = vld [vmem:[%s3050_s29 + $0x2b8] sm:$0xff]  ;;  %v1178_v17 = vmax.f32 %v994_v14, 0.0  ;;  %v1193_v31 = vmax.f32 %v1009_v28, 0.0  ;;  %v1375_v44 = vld [vmem:[%s3982_s1 + $0x2a0] sm:$0xff]  ;;  %v1005_v12 = vld [vmem:[%s3050_s29 + $0x290] sm:$0xff] }
 0x100   : > { %1551 = vmatmul.f32.gmra.mxu0 %v1303_v19  ;;  %1681 = vmatmul.f32.gmra.mxu2 %v1305_v21  ;;  %v1194_v19 = vmax.f32 %v1010_v16, 0.0  ;;  %v1353_v21 = vld [vmem:[%s3982_s1 + $0x1f0] sm:$0xff]  ;;  %v1007_v52 = vld [vmem:[%s3050_s29 + $0x2a0] sm:$0xff]  ;;  %v1006_v0 = vld [vmem:[%s3050_s29 + $0x298] sm:$0xff]  ;;  %v1189_v15 = vmax.f32 %v1005_v12, 0.0 }
 0x101   : > { %1989 = vmatpush.msrb.mxu3 %v1232_v22  ;;  %1859 = vmatpush.msrb.mxu1 %v1200_v23  ;;  %v1352_v22 = vld [vmem:[%s3982_s1 + $0x1e8] sm:$0xff]  ;;  %v1354_v23 = vld [vmem:[%s3982_s1 + $0x1f8] sm:$0xff]  ;;  %v1191_v55 = vmax.f32 %v1007_v52, 0.0  ;;  %v1387_v56 = vld [vmem:[%s3982_s1 + $0x300] sm:$0xff]  ;;  %v1190_v3 = vmax.f32 %v1006_v0, 0.0 }
 0x102   : > { %1616 = vmatmul.f32.gmra.mxu1 %v1304_v29  ;;  %1925 = vmatpush.msrb.mxu2 %v1215_v26  ;;  %v993_v26 = vld [vmem:[%s3050_s29 + $0x230] sm:$0xff]  ;;  %v1399_v4 = vld [vmem:[%s3982_s1 + $0x360] sm:$0xff]  ;;  %v1004_v24 = vld [vmem:[%s3050_s29 + $0x288] sm:$0xff] }
 0x103   : > { %1746 = vmatmul.f32.gmra.mxu3 %v1306_v33  ;;  %1795 = vmatpush.msrb.mxu0 %v1183_v30  ;;  %v1177_v29 = vmax.f32 %v993_v26, 0.0  ;;  %v1225_v30 = vmax.f32 %v1041_v27, 0.0  ;;  %v1365_v33 = vld [vmem:[%s3982_s1 + $0x250] sm:$0xff]  ;;  %v1411_v16 = vld [vmem:[%s3982_s1 + $0x3c0] sm:$0xff]  ;;  %v1188_v27 = vmax.f32 %v1004_v24, 0.0  ;;  %v1460_v0 = vld [vmem:[%s3982_s1 + $0x548] sm:$0xff] }
 0x104   : > { %1990 = vmatpush.msrb.mxu3 %v1231_v34  ;;  %1860 = vmatpush.msrb.mxu1 %v1199_v35  ;;  %v1364_v34 = vld [vmem:[%s3982_s1 + $0x248] sm:$0xff]  ;;  %v1366_v35 = vld [vmem:[%s3982_s1 + $0x258] sm:$0xff]  ;;  %v1423_v28 = vld [vmem:[%s3982_s1 + $0x420] sm:$0xff] }
 0x105   : > { %1926 = vmatpush.msrb.mxu2 %v1214_v37  ;;  %1796 = vmatpush.msrb.mxu0 %v1182_v38  ;;  %v1208_v37 = vmax.f32 %v1024_v36, 0.0  ;;  %v992_v38 = vld [vmem:[%s3050_s29 + $0x228] sm:$0xff]  ;;  %v1003_v36 = vld [vmem:[%s3050_s29 + $0x280] sm:$0xff]  ;;  %v1449_v52 = vld [vmem:[%s3982_s1 + $0x4f0] sm:$0xff] }
 0x106   : > { %1991 = vmatpush.msrb.mxu3 %v1230_v39  ;;  %1861 = vmatpush.msrb.mxu1 %v1198_v40  ;;  %v1040_v39 = vld [vmem:[%s3050_s29 + $0x3a8] sm:$0xff] }
 0x107   : > { %1927 = vmatpush.msrb.mxu2 %v1213_v41  ;;  %1797 = vmatpush.msrb.mxu0 %v1181_v45  ;;  %v1008_v40 = vld [vmem:[%s3050_s29 + $0x2a8] sm:$0xff]  ;;  %v1176_v41 = vmax.f32 %v992_v38, 0.0  ;;  %v1224_v42 = vmax.f32 %v1040_v39, 0.0  ;;  %v1377_v45 = vld [vmem:[%s3982_s1 + $0x2b0] sm:$0xff]  ;;  %v1187_v39 = vmax.f32 %v1003_v36, 0.0 }
 0x108   : > { %1554 = vmatmul.f32.gmra.mxu0 %v1315_v46  ;;  %1684 = vmatmul.f32.gmra.mxu2 %v1317_v47  ;;  %v1192_v43 = vmax.f32 %v1008_v40, 0.0  ;;  %v1376_v46 = vld [vmem:[%s3982_s1 + $0x2a8] sm:$0xff]  ;;  %v1378_v47 = vld [vmem:[%s3982_s1 + $0x2b8] sm:$0xff]  ;;  %v1435_v40 = vld [vmem:[%s3982_s1 + $0x480] sm:$0xff] }
 0x109   : > { %1992 = vmatpush.msrb.mxu3 %v1229_v48  ;;  %1862 = vmatpush.msrb.mxu1 %v1197_v49  ;;  %v1023_v48 = vld [vmem:[%s3050_s29 + $0x320] sm:$0xff]  ;;  %v1472_v12 = vld [vmem:[%s3982_s1 + $0x5a8] sm:$0xff] }
 0x10a   : > { %1619 = vmatmul.f32.gmra.mxu1 %v1316_v50  ;;  %1928 = vmatpush.msrb.mxu2 %v1212_v53  ;;  %v1207_v49 = vmax.f32 %v1023_v48, 0.0  ;;  %v991_v50 = vld [vmem:[%s3050_s29 + $0x220] sm:$0xff]  ;;  %v1296_v24 = vld [vmem:[%s3982_s1 + $0x28] sm:$0xff] }
 0x10b   : > { %1749 = vmatmul.f32.gmra.mxu3 %v1318_v51  ;;  %1798 = vmatpush.msrb.mxu0 %v1180_v57  ;;  %v1039_v51 = vld [vmem:[%s3050_s29 + $0x3a0] sm:$0xff]  ;;  %v1175_v53 = vmax.f32 %v991_v50, 0.0  ;;  %v1389_v57 = vld [vmem:[%s3982_s1 + $0x310] sm:$0xff]  ;;  %v1082_v50 = vld [vmem:[%s3050_s29 + $0x4f8] sm:$0xff] }
 0x10c   : > { %1993 = vmatpush.msrb.mxu3 %v1228_v58  ;;  %1863 = vmatpush.msrb.mxu1 %v1196_v59  ;;  %v1223_v54 = vmax.f32 %v1039_v51, 0.0  ;;  %v1388_v58 = vld [vmem:[%s3982_s1 + $0x308] sm:$0xff]  ;;  %v1390_v59 = vld [vmem:[%s3982_s1 + $0x318] sm:$0xff]  ;;  %v1447_v51 = vld [vmem:[%s3982_s1 + $0x4e0] sm:$0xff] }
 0x10d   : > { %1929 = vmatpush.msrb.mxu2 %v1211_v1  ;;  %1799 = vmatpush.msrb.mxu0 %v1179_v5  ;;  %v1401_v5 = vld [vmem:[%s3982_s1 + $0x370] sm:$0xff] }
 0x10e   : > { %1994 = vmatpush.msrb.mxu3 %v1227_v6  ;;  %1864 = vmatpush.msrb.mxu1 %v1195_v7  ;;  %v1400_v6 = vld [vmem:[%s3982_s1 + $0x368] sm:$0xff]  ;;  %v1402_v7 = vld [vmem:[%s3982_s1 + $0x378] sm:$0xff] }
 0x10f   : > { %1930 = vmatpush.msrb.mxu2 %v1210_v13  ;;  %1800 = vmatpush.msrb.mxu0 %v1178_v17  ;;  %v1413_v17 = vld [vmem:[%s3982_s1 + $0x3d0] sm:$0xff] }
 0x110   : > { %1557 = vmatmul.f32.gmra.mxu0 %v1327_v60  ;;  %1687 = vmatmul.f32.gmra.mxu2 %v1329_v61  ;;  %v1022_v60 = vld [vmem:[%s3050_s29 + $0x318] sm:$0xff] }
 0x111   : > { %1995 = vmatpush.msrb.mxu3 %v1226_v18  ;;  %1865 = vmatpush.msrb.mxu1 %v1194_v19  ;;  %v1206_v61 = vmax.f32 %v1022_v60, 0.0  ;;  %v1412_v18 = vld [vmem:[%s3982_s1 + $0x3c8] sm:$0xff]  ;;  %v1414_v19 = vld [vmem:[%s3982_s1 + $0x3d8] sm:$0xff]  ;;  %v1081_v60 = vld [vmem:[%s3050_s29 + $0x4f0] sm:$0xff] }
 0x112   : > { %1622 = vmatmul.f32.gmra.mxu1 %v1328_v62  ;;  %1931 = vmatpush.msrb.mxu2 %v1209_v25  ;;  %v990_v62 = vld [vmem:[%s3050_s29 + $0x218] sm:$0xff] }
 0x113   : > { %1752 = vmatmul.f32.gmra.mxu3 %v1330_v63  ;;  %1801 = vmatpush.msrb.mxu0 %v1177_v29  ;;  %v1038_v63 = vld [vmem:[%s3050_s29 + $0x398] sm:$0xff]  ;;  %v1174_v1 = vmax.f32 %v990_v62, 0.0  ;;  %v1425_v29 = vld [vmem:[%s3982_s1 + $0x430] sm:$0xff] }
 0x114   : > { %1996 = vmatpush.msrb.mxu3 %v1225_v30  ;;  %1866 = vmatpush.msrb.mxu1 %v1193_v31  ;;  %v1222_v2 = vmax.f32 %v1038_v63, 0.0  ;;  %v1424_v30 = vld [vmem:[%s3982_s1 + $0x428] sm:$0xff]  ;;  %v1426_v31 = vld [vmem:[%s3982_s1 + $0x438] sm:$0xff]  ;;  %v1461_v62 = vld [vmem:[%s3982_s1 + $0x550] sm:$0xff]  ;;  %v1265_v63 = vmax.f32 %v1081_v60, 0.0 }
 0x115   : > { %1932 = vmatpush.msrb.mxu2 %v1208_v37  ;;  %1802 = vmatpush.msrb.mxu0 %v1176_v41  ;;  %v1437_v41 = vld [vmem:[%s3982_s1 + $0x490] sm:$0xff]  ;;  %v1320_v60 = vld [vmem:[%s3982_s1 + $0xe8] sm:$0xff] }
 0x116   : > { %1997 = vmatpush.msrb.mxu3 %v1224_v42  ;;  %1867 = vmatpush.msrb.mxu1 %v1192_v43  ;;  %v1436_v42 = vld [vmem:[%s3982_s1 + $0x488] sm:$0xff]  ;;  %v1438_v43 = vld [vmem:[%s3982_s1 + $0x498] sm:$0xff] }
 0x117   : > { %1933 = vmatpush.msrb.mxu2 %v1207_v49  ;;  %1803 = vmatpush.msrb.mxu0 %v1175_v53  ;;  %v1266_v53 = vmax.f32 %v1082_v50, 0.0 }
 0x118   : > { %1560 = vmatmul.f32.gmra.mxu0 %v1339_v8  ;;  %1690 = vmatmul.f32.gmra.mxu2 %v1341_v9  ;;  %v1021_v8 = vld [vmem:[%s3050_s29 + $0x310] sm:$0xff] }
 0x119   : > { %1998 = vmatpush.msrb.mxu3 %v1223_v54  ;;  %1868 = vmatpush.msrb.mxu1 %v1191_v55  ;;  %v1205_v9 = vmax.f32 %v1021_v8, 0.0  ;;  %v1448_v54 = vld [vmem:[%s3982_s1 + $0x4e8] sm:$0xff]  ;;  %v1450_v55 = vld [vmem:[%s3982_s1 + $0x4f8] sm:$0xff] }
 0x11a   : > { %1625 = vmatmul.f32.gmra.mxu1 %v1340_v10  ;;  %1934 = vmatpush.msrb.mxu2 %v1206_v61  ;;  %v989_v10 = vld [vmem:[%s3050_s29 + $0x210] sm:$0xff]  ;;  %v1459_v61 = vld [vmem:[%s3982_s1 + $0x540] sm:$0xff]  ;;  %v1080_v8 = vld [vmem:[%s3050_s29 + $0x4e8] sm:$0xff] }
 0x11b   : > { %1755 = vmatmul.f32.gmra.mxu3 %v1342_v11  ;;  %1804 = vmatpush.msrb.mxu0 %v1174_v1  ;;  %v1037_v11 = vld [vmem:[%s3050_s29 + $0x390] sm:$0xff]  ;;  %v1173_v13 = vmax.f32 %v989_v10, 0.0  ;;  %v1462_v1 = vld [vmem:[%s3982_s1 + $0x558] sm:$0xff] }
 0x11c   : > { %1999 = vmatpush.msrb.mxu3 %v1222_v2  ;;  %1869 = vmatpush.msrb.mxu1 %v1190_v3  ;;  %v1221_v14 = vmax.f32 %v1037_v11, 0.0  ;;  %v1096_v2 = vld [vmem:[%s3050_s29 + $0x568] sm:$0xff]  ;;  %v1473_v10 = vld [vmem:[%s3982_s1 + $0x5b0] sm:$0xff]  ;;  %v1264_v11 = vmax.f32 %v1080_v8, 0.0 }
 0x11d   : > { %1935 = vmatpush.msrb.mxu2 %v1205_v9  ;;  %1805 = vmatpush.msrb.mxu0 %v1173_v13  ;;  %v1280_v3 = vmax.f32 %v1096_v2, 0.0  ;;  %v1471_v9 = vld [vmem:[%s3982_s1 + $0x5a0] sm:$0xff]  ;;  %v1474_v13 = vld [vmem:[%s3982_s1 + $0x5b8] sm:$0xff]  ;;  %v1060_v2 = vld [vmem:[%s3050_s29 + $0x448] sm:$0xff] }
 0x11e   : > { %2000 = vmatpush.msrb.mxu3 %v1221_v14  ;;  %1870 = vmatpush.msrb.mxu1 %v1189_v15  ;;  %v1095_v14 = vld [vmem:[%s3050_s29 + $0x560] sm:$0xff] }
 0x11f   : > { %v1279_v15 = vmax.f32 %v1095_v14, 0.0 }
 0x120   : > { %1563 = vmatmul.f32.gmra.mxu0 %v1351_v20  ;;  %1693 = vmatmul.f32.gmra.mxu2 %v1353_v21  ;;  %v1020_v20 = vld [vmem:[%s3050_s29 + $0x308] sm:$0xff] }
 0x121   : > { %v1204_v21 = vmax.f32 %v1020_v20, 0.0  ;;  %1871 = vmatpush.msrb.mxu1 %v1188_v27  ;;  %v1295_v20 = vld [vmem:[%s3982_s1 + $0x20] sm:$0xff] }
 0x122   : > { %1628 = vmatmul.f32.gmra.mxu1 %v1352_v22  ;;  %v988_v22 = vld [vmem:[%s3050_s29 + $0x208] sm:$0xff] }
 0x123   : > { %1758 = vmatmul.f32.gmra.mxu3 %v1354_v23  ;;  %1936 = vmatpush.msrb.mxu2 %v1204_v21  ;;  %v1036_v23 = vld [vmem:[%s3050_s29 + $0x388] sm:$0xff]  ;;  %v1172_v25 = vmax.f32 %v988_v22, 0.0  ;;  %v1297_v21 = vld [vmem:[%s3982_s1 + $0x30] sm:$0xff] }
 0x124   : > { %v1220_v26 = vmax.f32 %v1036_v23, 0.0  ;;  %1872 = vmatpush.msrb.mxu1 %v1187_v39 }
 0x125   : > { %1806 = vmatpush.msrb.mxu0 %v1172_v25  ;;  %v1298_v25 = vld [vmem:[%s3982_s1 + $0x38] sm:$0xff] }
 0x126   : > { %2001 = vmatpush.msrb.mxu3 %v1220_v26  ;;  %2117 = vmatpush.msra.mxu1 %v1266_v53  ;;  %v1094_v26 = vld [vmem:[%s3050_s29 + $0x558] sm:$0xff] }
 0x127   : > { %v1278_v27 = vmax.f32 %v1094_v26, 0.0  ;;  %v1343_v26 = vld [vmem:[%s3982_s1 + $0x1a0] sm:$0xff] }
 0x128   : > { %1566 = vmatmul.f32.gmra.mxu0 %v1363_v32  ;;  %1696 = vmatmul.f32.gmra.mxu2 %v1365_v33  ;;  %v1019_v32 = vld [vmem:[%s3050_s29 + $0x300] sm:$0xff] }
 0x129   : > { %v1203_v33 = vmax.f32 %v1019_v32, 0.0  ;;  %2118 = vmatpush.msra.mxu1 %v1265_v63 }
 0x12a   : > { %1631 = vmatmul.f32.gmra.mxu1 %v1364_v34  ;;  %v987_v34 = vld [vmem:[%s3050_s29 + $0x200] sm:$0xff] }
 0x12b   : > { %1761 = vmatmul.f32.gmra.mxu3 %v1366_v35  ;;  %1937 = vmatpush.msrb.mxu2 %v1203_v33  ;;  %v1035_v35 = vld [vmem:[%s3050_s29 + $0x380] sm:$0xff]  ;;  %v1171_v37 = vmax.f32 %v987_v34, 0.0 }
 0x12c   : > { %v1219_v38 = vmax.f32 %v1035_v35, 0.0  ;;  %2119 = vmatpush.msra.mxu1 %v1264_v11  ;;  %v1078_v35 = vld [vmem:[%s3050_s29 + $0x4d8] sm:$0xff] }
 0x12d   : > { %1807 = vmatpush.msrb.mxu0 %v1171_v37  ;;  %v1307_v37 = vld [vmem:[%s3982_s1 + $0x80] sm:$0xff]  ;;  %v1262_v39 = vmax.f32 %v1078_v35, 0.0 }
 0x12e   : > { %2002 = vmatpush.msrb.mxu3 %v1219_v38  ;;  %v1309_v38 = vld [vmem:[%s3982_s1 + $0x90] sm:$0xff] }
 0x130   : > { %1569 = vmatmul.f32.gmra.mxu0 %v1375_v44  ;;  %1699 = vmatmul.f32.gmra.mxu2 %v1377_v45  ;;  %v1098_v44 = vld [vmem:[%s3050_s29 + $0x578] sm:$0xff] }
 0x131   : > { %v1282_v45 = vmax.f32 %v1098_v44, 0.0  ;;  %v1310_v44 = vld [vmem:[%s3982_s1 + $0x98] sm:$0xff] }
 0x132   : > { %1634 = vmatmul.f32.gmra.mxu1 %v1376_v46  ;;  %v1066_v46 = vld [vmem:[%s3050_s29 + $0x478] sm:$0xff] }
 0x133   : > { %1764 = vmatmul.f32.gmra.mxu3 %v1378_v47  ;;  %2182 = vmatpush.msra.mxu2 %v1282_v45  ;;  %v1106_v47 = vld [vmem:[%s3050_s29 + $0x5b8] sm:$0xff]  ;;  %v1250_v48 = vmax.f32 %v1066_v46, 0.0  ;;  %v1093_v45 = vld [vmem:[%s3050_s29 + $0x550] sm:$0xff] }
 0x134   : > { %v1290_v49 = vmax.f32 %v1106_v47, 0.0  ;;  %v1277_v46 = vmax.f32 %v1093_v45, 0.0 }
 0x135   : > { %2052 = vmatpush.msra.mxu0 %v1250_v48 }
 0x136   : > { %2255 = vmatpush.msra.mxu3 %v1290_v49  ;;  %v1061_v49 = vld [vmem:[%s3050_s29 + $0x450] sm:$0xff] }
 0x138   : > { %1572 = vmatmul.f32.gmra.mxu0 %v1387_v56  ;;  %1702 = vmatmul.f32.gmra.mxu2 %v1389_v57  ;;  %v1097_v56 = vld [vmem:[%s3050_s29 + $0x570] sm:$0xff] }
 0x139   : > { %v1281_v57 = vmax.f32 %v1097_v56, 0.0 }
 0x13a   : > { %1637 = vmatmul.f32.gmra.mxu1 %v1388_v58  ;;  %v1065_v58 = vld [vmem:[%s3050_s29 + $0x470] sm:$0xff] }
 0x13b   : > { %1767 = vmatmul.f32.gmra.mxu3 %v1390_v59  ;;  %2183 = vmatpush.msra.mxu2 %v1281_v57  ;;  %v1249_v59 = vmax.f32 %v1065_v58, 0.0 }
 0x13d   : > { %2053 = vmatpush.msra.mxu0 %v1249_v59  ;;  %2184 = vmatpush.msra.mxu2 %v1280_v3  ;;  %v1103_v3 = vld [vmem:[%s3050_s29 + $0x5a0] sm:$0xff] }
 0x13f   : > { %2185 = vmatpush.msra.mxu2 %v1279_v15  ;;  %v1332_v15 = vld [vmem:[%s3982_s1 + $0x148] sm:$0xff] }
 0x140   : > { %1575 = vmatmul.f32.gmra.mxu0 %v1399_v4  ;;  %1705 = vmatmul.f32.gmra.mxu2 %v1401_v5  ;;  %v1064_v4 = vld [vmem:[%s3050_s29 + $0x468] sm:$0xff]  ;;  %v1105_v5 = vld [vmem:[%s3050_s29 + $0x5b0] sm:$0xff] }
 0x141   : > { %2186 = vmatpush.msra.mxu2 %v1278_v27  ;;  %v1345_v27 = vld [vmem:[%s3982_s1 + $0x1b0] sm:$0xff] }
 0x142   : > { %1640 = vmatmul.f32.gmra.mxu1 %v1400_v6  ;;  %v1248_v6 = vmax.f32 %v1064_v4, 0.0 }
 0x143   : > { %1770 = vmatmul.f32.gmra.mxu3 %v1402_v7  ;;  %v1289_v7 = vmax.f32 %v1105_v5, 0.0  ;;  %2187 = vmatpush.msra.mxu2 %v1277_v46  ;;  %v1244_v5 = vmax.f32 %v1060_v2, 0.0  ;;  %v1355_v46 = vld [vmem:[%s3982_s1 + $0x200] sm:$0xff] }
 0x144   : > { %2054 = vmatpush.msra.mxu0 %v1248_v6  ;;  %v1287_v6 = vmax.f32 %v1103_v3, 0.0 }
 0x145   : > { %2256 = vmatpush.msra.mxu3 %v1289_v7  ;;  %v1076_v7 = vld [vmem:[%s3050_s29 + $0x4c8] sm:$0xff] }
 0x146   : > { %v1260_v11 = vmax.f32 %v1076_v7, 0.0  ;;  %v1370_v7 = vld [vmem:[%s3982_s1 + $0x278] sm:$0xff] }
 0x148   : > { %1578 = vmatmul.f32.gmra.mxu0 %v1411_v16  ;;  %1708 = vmatmul.f32.gmra.mxu2 %v1413_v17  ;;  %v1063_v16 = vld [vmem:[%s3050_s29 + $0x460] sm:$0xff] }
 0x149   : > { %v1247_v17 = vmax.f32 %v1063_v16, 0.0  ;;  %v1334_v16 = vld [vmem:[%s3982_s1 + $0x158] sm:$0xff] }
 0x14a   : > { %1643 = vmatmul.f32.gmra.mxu1 %v1412_v18  ;;  %v1079_v18 = vld [vmem:[%s3050_s29 + $0x4e0] sm:$0xff] }
 0x14b   : > { %1773 = vmatmul.f32.gmra.mxu3 %v1414_v19  ;;  %v1263_v22 = vmax.f32 %v1079_v18, 0.0  ;;  %2055 = vmatpush.msra.mxu0 %v1247_v17  ;;  %v1091_v17 = vld [vmem:[%s3050_s29 + $0x540] sm:$0xff] }
 0x14c   : > { %v1275_v18 = vmax.f32 %v1091_v17, 0.0 }
 0x14d   : > { %2120 = vmatpush.msra.mxu1 %v1263_v22 }
 0x14f   : > { %2121 = vmatpush.msra.mxu1 %v1262_v39  ;;  %v1102_v39 = vld [vmem:[%s3050_s29 + $0x598] sm:$0xff] }
 0x150   : > { %1581 = vmatmul.f32.gmra.mxu0 %v1423_v28  ;;  %1711 = vmatmul.f32.gmra.mxu2 %v1425_v29 }
 0x152   : > { %1646 = vmatmul.f32.gmra.mxu1 %v1424_v30  ;;  %v1062_v30 = vld [vmem:[%s3050_s29 + $0x458] sm:$0xff] }
 0x153   : > { %1776 = vmatmul.f32.gmra.mxu3 %v1426_v31  ;;  %v1104_v31 = vld [vmem:[%s3050_s29 + $0x5a8] sm:$0xff]  ;;  %v1246_v33 = vmax.f32 %v1062_v30, 0.0 }
 0x154   : > { %v1288_v34 = vmax.f32 %v1104_v31, 0.0 }
 0x155   : > { %2056 = vmatpush.msra.mxu0 %v1246_v33  ;;  %v1346_v33 = vld [vmem:[%s3982_s1 + $0x1b8] sm:$0xff] }
 0x156   : > { %2257 = vmatpush.msra.mxu3 %v1288_v34  ;;  %v1090_v34 = vld [vmem:[%s3050_s29 + $0x538] sm:$0xff] }
 0x157   : > { %v1274_v35 = vmax.f32 %v1090_v34, 0.0 }
 0x158   : > { %1584 = vmatmul.f32.gmra.mxu0 %v1435_v40  ;;  %1714 = vmatmul.f32.gmra.mxu2 %v1437_v41 }
 0x159   : > { %2258 = vmatpush.msra.mxu3 %v1287_v6  ;;  %v1368_v6 = vld [vmem:[%s3982_s1 + $0x268] sm:$0xff] }
 0x15a   : > { %1649 = vmatmul.f32.gmra.mxu1 %v1436_v42 }
 0x15b   : > { %1779 = vmatmul.f32.gmra.mxu3 %v1438_v43  ;;  %v1308_v43 = vld [vmem:[%s3982_s1 + $0x88] sm:$0xff] }
 0x160   : > { %1587 = vmatmul.f32.gmra.mxu0 %v1447_v51  ;;  %1717 = vmatmul.f32.gmra.mxu2 %v1449_v52  ;;  %v1245_v51 = vmax.f32 %v1061_v49, 0.0  ;;  %v1077_v52 = vld [vmem:[%s3050_s29 + $0x4d0] sm:$0xff] }
 0x161   : > { %v1261_v56 = vmax.f32 %v1077_v52, 0.0  ;;  %v1356_v52 = vld [vmem:[%s3982_s1 + $0x208] sm:$0xff] }
 0x162   : > { %1652 = vmatmul.f32.gmra.mxu1 %v1448_v54  ;;  %v1319_v54 = vld [vmem:[%s3982_s1 + $0xe0] sm:$0xff]  ;;  %2057 = vmatpush.msra.mxu0 %v1245_v51 }
 0x163   : > { %1782 = vmatmul.f32.gmra.mxu3 %v1450_v55  ;;  %v1321_v55 = vld [vmem:[%s3982_s1 + $0xf0] sm:$0xff]  ;;  %2122 = vmatpush.msra.mxu1 %v1261_v56 }
 0x164   : > { %2058 = vmatpush.msra.mxu0 %v1244_v5 }
 0x165   : > { %2123 = vmatpush.msra.mxu1 %v1260_v11 }
 0x168   : > { %1590 = vmatmul.f32.gmra.mxu0 %v1459_v61  ;;  %1720 = vmatmul.f32.gmra.mxu2 %v1461_v62  ;;  %v1322_v61 = vld [vmem:[%s3982_s1 + $0xf8] sm:$0xff]  ;;  %v1092_v62 = vld [vmem:[%s3050_s29 + $0x548] sm:$0xff] }
 0x169   : > { %v1276_v63 = vmax.f32 %v1092_v62, 0.0  ;;  %v1073_v62 = vld [vmem:[%s3050_s29 + $0x4b0] sm:$0xff] }
 0x16a   : > { %1655 = vmatmul.f32.gmra.mxu1 %v1460_v0  ;;  %v1257_v2 = vmax.f32 %v1073_v62, 0.0 }
 0x16b   : > { %1785 = vmatmul.f32.gmra.mxu3 %v1462_v1  ;;  %2188 = vmatpush.msra.mxu2 %v1276_v63 }
 0x16d   : > { %2189 = vmatpush.msra.mxu2 %v1275_v18  ;;  %v1072_v18 = vld [vmem:[%s3050_s29 + $0x4a8] sm:$0xff] }
 0x16f   : > { %2190 = vmatpush.msra.mxu2 %v1274_v35 }
 0x170   : > { %1593 = vmatmul.f32.gmra.mxu0 %v1471_v9  ;;  %1723 = vmatmul.f32.gmra.mxu2 %v1473_v10  ;;  %v1331_v9 = vld [vmem:[%s3982_s1 + $0x140] sm:$0xff]  ;;  %v1333_v10 = vld [vmem:[%s3982_s1 + $0x150] sm:$0xff] }
 0x172   : > { %1658 = vmatmul.f32.gmra.mxu1 %v1472_v12 }
 0x173   : > { %1788 = vmatmul.f32.gmra.mxu3 %v1474_v13 }
 0x175   : > { %v1549_v19 = vpop.f32.mrf.mxu0 }
 0x177   : > { %v1614_v23 = vpop.f32.mrf.mxu1 }
 0x178   : > { %1808 = vmatmul.f32.vlgmr.msrb.gmra.mxu0 %v1295_v20  ;;  %1938 = vmatmul.f32.vlgmr.msrb.gmra.mxu2 %v1297_v21  ;;  %v1615_v28 = vadd.f32 %v1614_v23, %v1549_v19  ;;  %v1059_v21 = vld [vmem:[%s3050_s29 + $0x440] sm:$0xff] }
 0x179   : > { %v1243_v23 = vmax.f32 %v1059_v21, 0.0  ;;  %v1381_v21 = vld [vmem:[%s3982_s1 + $0x2d0] sm:$0xff] }
 0x17a   : > { %1873 = vmatmul.f32.vlgmr.msrb.gmra.mxu1 %v1296_v24  ;;  %v1075_v24 = vld [vmem:[%s3050_s29 + $0x4c0] sm:$0xff] }
 0x17b   : > { %2003 = vmatmul.f32.vlgmr.msrb.gmra.mxu3 %v1298_v25  ;;  %v1679_v29 = vpop.f32.mrf.mxu2  ;;  %2059 = vmatpush.msra.mxu0 %v1243_v23 }
 0x17c   : > { %v1680_v32 = vadd.f32 %v1679_v29, %v1615_v28  ;;  %v1259_v28 = vmax.f32 %v1075_v24, 0.0 }
 0x17d   : > { %v1552_v36 = vpop.f32.mrf.mxu0 }
 0x17e   : > { %v1744_v40 = vpop.f32.mrf.mxu3  ;;  %2124 = vmatpush.msra.mxu1 %v1259_v28  ;;  %v1087_v28 = vld [vmem:[%s3050_s29 + $0x520] sm:$0xff] }
 0x17f   : > { %v3408_v41 = vadd.f32 %v1744_v40, %v1680_v32  ;;  %v1617_v42 = vpop.f32.mrf.mxu1  ;;  %v1344_v32 = vld [vmem:[%s3982_s1 + $0x1a8] sm:$0xff] }
 0x180   : > { %1811 = vmatmul.f32.gmra.mxu0 %v1307_v37  ;;  %1941 = vmatmul.f32.gmra.mxu2 %v1309_v38  ;;  %v1618_v47 = vadd.f32 %v1617_v42, %v1552_v36  ;;  %v1058_v38 = vld [vmem:[%s3050_s29 + $0x438] sm:$0xff] }
 0x181   : > { %v1242_v42 = vmax.f32 %v1058_v38, 0.0  ;;  %v1391_v38 = vld [vmem:[%s3982_s1 + $0x320] sm:$0xff] }
 0x182   : > { %1876 = vmatmul.f32.gmra.mxu1 %v1308_v43  ;;  %v1286_v43 = vmax.f32 %v1102_v39, 0.0  ;;  %v1393_v39 = vld [vmem:[%s3982_s1 + $0x330] sm:$0xff] }
 0x183   : > { %2006 = vmatmul.f32.gmra.mxu3 %v1310_v44  ;;  %v1682_v48 = vpop.f32.mrf.mxu2  ;;  %v1074_v44 = vld [vmem:[%s3050_s29 + $0x4b8] sm:$0xff]  ;;  %2060 = vmatpush.msra.mxu0 %v1242_v42 }
 0x184   : > { %v1683_v50 = vadd.f32 %v1682_v48, %v1618_v47  ;;  %v1357_v47 = vld [vmem:[%s3982_s1 + $0x210] sm:$0xff]  ;;  %v1258_v48 = vmax.f32 %v1074_v44, 0.0  ;;  %2259 = vmatpush.msra.mxu3 %v1286_v43 }
 0x185   : > { %v1555_v53 = vpop.f32.mrf.mxu0 }
 0x186   : > { %v1747_v57 = vpop.f32.mrf.mxu3  ;;  %2125 = vmatpush.msra.mxu1 %v1258_v48 }
 0x187   : > { %v3425_v58 = vadd.f32 %v1747_v57, %v1683_v50  ;;  %v1620_v59 = vpop.f32.mrf.mxu1 }
 0x188   : > { %1814 = vmatmul.f32.gmra.mxu0 %v1319_v54  ;;  %1944 = vmatmul.f32.gmra.mxu2 %v1321_v55  ;;  %v1621_v0 = vadd.f32 %v1620_v59, %v1555_v53  ;;  %v1358_v53 = vld [vmem:[%s3982_s1 + $0x218] sm:$0xff]  ;;  %v1089_v54 = vld [vmem:[%s3050_s29 + $0x530] sm:$0xff] }
 0x189   : > { %v1273_v55 = vmax.f32 %v1089_v54, 0.0  ;;  %v1057_v59 = vld [vmem:[%s3050_s29 + $0x430] sm:$0xff]  ;;  %2126 = vmatpush.msra.mxu1 %v1257_v2  ;;  %v1404_v2 = vld [vmem:[%s3982_s1 + $0x388] sm:$0xff] }
 0x18a   : > { %1879 = vmatmul.f32.gmra.mxu1 %v1320_v60 }
 0x18b   : > { %2009 = vmatmul.f32.gmra.mxu3 %v1322_v61  ;;  %v1685_v1 = vpop.f32.mrf.mxu2  ;;  %2191 = vmatpush.msra.mxu2 %v1273_v55  ;;  %v1241_v61 = vmax.f32 %v1057_v59, 0.0 }
 0x18c   : > { %v1686_v4 = vadd.f32 %v1685_v1, %v1621_v0  ;;  %v1367_v0 = vld [vmem:[%s3982_s1 + $0x260] sm:$0xff]  ;;  %v1369_v1 = vld [vmem:[%s3982_s1 + $0x270] sm:$0xff] }
 0x18d   : > { %v1558_v8 = vpop.f32.mrf.mxu0  ;;  %2061 = vmatpush.msra.mxu0 %v1241_v61  ;;  %v1405_v61 = vld [vmem:[%s3982_s1 + $0x390] sm:$0xff] }
 0x18e   : > { %v1750_v12 = vpop.f32.mrf.mxu3 }
 0x18f   : > { %v3443_v13 = vadd.f32 %v1750_v12, %v1686_v4  ;;  %v1623_v14 = vpop.f32.mrf.mxu1  ;;  %v1056_v12 = vld [vmem:[%s3050_s29 + $0x428] sm:$0xff] }
 0x190   : > { %1817 = vmatmul.f32.gmra.mxu0 %v1331_v9  ;;  %1947 = vmatmul.f32.gmra.mxu2 %v1333_v10  ;;  %v1624_v19 = vadd.f32 %v1623_v14, %v1558_v8  ;;  %v1088_v8 = vld [vmem:[%s3050_s29 + $0x528] sm:$0xff]  ;;  %v1101_v14 = vld [vmem:[%s3050_s29 + $0x590] sm:$0xff] }
 0x191   : > { %v1272_v9 = vmax.f32 %v1088_v8, 0.0  ;;  %v1285_v17 = vmax.f32 %v1101_v14, 0.0 }
 0x192   : > { %1882 = vmatmul.f32.gmra.mxu1 %v1332_v15 }
 0x193   : > { %2012 = vmatmul.f32.gmra.mxu3 %v1334_v16  ;;  %v1688_v20 = vpop.f32.mrf.mxu2  ;;  %2192 = vmatpush.msra.mxu2 %v1272_v9  ;;  %v1240_v16 = vmax.f32 %v1056_v12, 0.0  ;;  %v1053_v9 = vld [vmem:[%s3050_s29 + $0x410] sm:$0xff] }
 0x194   : > { %v1689_v22 = vadd.f32 %v1688_v20, %v1624_v19  ;;  %v1379_v20 = vld [vmem:[%s3982_s1 + $0x2c0] sm:$0xff]  ;;  %2260 = vmatpush.msra.mxu3 %v1285_v17  ;;  %v1069_v12 = vld [vmem:[%s3050_s29 + $0x490] sm:$0xff] }
 0x195   : > { %v1561_v25 = vpop.f32.mrf.mxu0  ;;  %2062 = vmatpush.msra.mxu0 %v1240_v16  ;;  %v1417_v16 = vld [vmem:[%s3982_s1 + $0x3f0] sm:$0xff]  ;;  %v1253_v17 = vmax.f32 %v1069_v12, 0.0  ;;  %v1452_v12 = vld [vmem:[%s3982_s1 + $0x508] sm:$0xff] }
 0x196   : > { %v1753_v29 = vpop.f32.mrf.mxu3 }
 0x197   : > { %v3460_v30 = vadd.f32 %v1753_v29, %v1689_v22  ;;  %v1626_v31 = vpop.f32.mrf.mxu1  ;;  %v1256_v22 = vmax.f32 %v1072_v18, 0.0  ;;  %v1271_v29 = vmax.f32 %v1087_v28, 0.0  ;;  %v1052_v28 = vld [vmem:[%s3050_s29 + $0x408] sm:$0xff] }
 0x198   : > { %1820 = vmatmul.f32.gmra.mxu0 %v1343_v26  ;;  %1950 = vmatmul.f32.gmra.mxu2 %v1345_v27  ;;  %v1627_v36 = vadd.f32 %v1626_v31, %v1561_v25  ;;  %v1380_v26 = vld [vmem:[%s3982_s1 + $0x2c8] sm:$0xff]  ;;  %v1382_v27 = vld [vmem:[%s3982_s1 + $0x2d8] sm:$0xff] }
 0x199   : > { %2127 = vmatpush.msra.mxu1 %v1256_v22  ;;  %2193 = vmatpush.msra.mxu2 %v1271_v29  ;;  %v1418_v22 = vld [vmem:[%s3982_s1 + $0x3f8] sm:$0xff]  ;;  %v1099_v29 = vld [vmem:[%s3050_s29 + $0x580] sm:$0xff] }
 0x19a   : > { %1885 = vmatmul.f32.gmra.mxu1 %v1344_v32 }
 0x19b   : > { %2015 = vmatmul.f32.gmra.mxu3 %v1346_v33  ;;  %v1691_v37 = vpop.f32.mrf.mxu2  ;;  %v1055_v33 = vld [vmem:[%s3050_s29 + $0x420] sm:$0xff] }
 0x19c   : > { %v1692_v40 = vadd.f32 %v1691_v37, %v1627_v36  ;;  %v1239_v35 = vmax.f32 %v1055_v33, 0.0  ;;  %v1071_v36 = vld [vmem:[%s3050_s29 + $0x4a0] sm:$0xff]  ;;  %v1283_v33 = vmax.f32 %v1099_v29, 0.0 }
 0x19d   : > { %v1564_v45 = vpop.f32.mrf.mxu0 }
 0x19e   : > { %v1756_v49 = vpop.f32.mrf.mxu3  ;;  %2063 = vmatpush.msra.mxu0 %v1239_v35 }
 0x19f   : > { %v3478_v50 = vadd.f32 %v1756_v49, %v1692_v40  ;;  %v1629_v51 = vpop.f32.mrf.mxu1  ;;  %v1255_v40 = vmax.f32 %v1071_v36, 0.0  ;;  %v1427_v36 = vld [vmem:[%s3982_s1 + $0x440] sm:$0xff] }
 0x1a0   : > { %1823 = vmatmul.f32.gmra.mxu0 %v1355_v46  ;;  %1953 = vmatmul.f32.gmra.mxu2 %v1357_v47  ;;  %v1630_v56 = vadd.f32 %v1629_v51, %v1564_v45  ;;  %v1392_v45 = vld [vmem:[%s3982_s1 + $0x328] sm:$0xff]  ;;  %v1394_v46 = vld [vmem:[%s3982_s1 + $0x338] sm:$0xff] }
 0x1a1   : > { %2128 = vmatpush.msra.mxu1 %v1255_v40  ;;  %v1086_v47 = vld [vmem:[%s3050_s29 + $0x518] sm:$0xff] }
 0x1a2   : > { %1888 = vmatmul.f32.gmra.mxu1 %v1356_v52  ;;  %v1270_v48 = vmax.f32 %v1086_v47, 0.0  ;;  %v1054_v52 = vld [vmem:[%s3050_s29 + $0x418] sm:$0xff] }
 0x1a3   : > { %2018 = vmatmul.f32.gmra.mxu3 %v1358_v53  ;;  %v1694_v57 = vpop.f32.mrf.mxu2  ;;  %v1100_v53 = vld [vmem:[%s3050_s29 + $0x588] sm:$0xff]  ;;  %v1238_v55 = vmax.f32 %v1054_v52, 0.0 }
 0x1a4   : > { %v1695_v60 = vadd.f32 %v1694_v57, %v1630_v56  ;;  %2194 = vmatpush.msra.mxu2 %v1270_v48  ;;  %v1284_v56 = vmax.f32 %v1100_v53, 0.0  ;;  %v1070_v57 = vld [vmem:[%s3050_s29 + $0x498] sm:$0xff] }
 0x1a5   : > { %v1567_v63 = vpop.f32.mrf.mxu0  ;;  %v1254_v62 = vmax.f32 %v1070_v57, 0.0  ;;  %2064 = vmatpush.msra.mxu0 %v1238_v55  ;;  %v1441_v57 = vld [vmem:[%s3982_s1 + $0x4b0] sm:$0xff] }
 0x1a6   : > { %v1759_v3 = vpop.f32.mrf.mxu3  ;;  %2261 = vmatpush.msra.mxu3 %v1284_v56  ;;  %v1439_v56 = vld [vmem:[%s3982_s1 + $0x4a0] sm:$0xff] }
 0x1a7   : > { %v3495_v4 = vadd.f32 %v1759_v3, %v1695_v60  ;;  %v1632_v5 = vpop.f32.mrf.mxu1  ;;  %v1403_v60 = vld [vmem:[%s3982_s1 + $0x380] sm:$0xff]  ;;  %2129 = vmatpush.msra.mxu1 %v1254_v62  ;;  %v1406_v3 = vld [vmem:[%s3982_s1 + $0x398] sm:$0xff] }
 0x1a8   : > { %1826 = vmatmul.f32.gmra.mxu0 %v1367_v0  ;;  %1956 = vmatmul.f32.gmra.mxu2 %v1369_v1  ;;  %v1633_v10 = vadd.f32 %v1632_v5, %v1567_v63  ;;  %v1085_v5 = vld [vmem:[%s3050_s29 + $0x510] sm:$0xff] }
 0x1a9   : > { %2130 = vmatpush.msra.mxu1 %v1253_v17  ;;  %2262 = vmatpush.msra.mxu3 %v1283_v33  ;;  %v1475_v33 = vld [vmem:[%s3982_s1 + $0x5c0] sm:$0xff] }
 0x1aa   : > { %1891 = vmatmul.f32.gmra.mxu1 %v1368_v6  ;;  %v1269_v6 = vmax.f32 %v1085_v5, 0.0 }
 0x1ab   : > { %2021 = vmatmul.f32.gmra.mxu3 %v1370_v7  ;;  %v1697_v11 = vpop.f32.mrf.mxu2 }
 0x1ac   : > { %v1698_v15 = vadd.f32 %v1697_v11, %v1633_v10  ;;  %2195 = vmatpush.msra.mxu2 %v1269_v6  ;;  %v1237_v11 = vmax.f32 %v1053_v9, 0.0 }
 0x1ad   : > { %v1570_v19 = vpop.f32.mrf.mxu0 }
 0x1ae   : > { %v1762_v23 = vpop.f32.mrf.mxu3  ;;  %2065 = vmatpush.msra.mxu0 %v1237_v11 }
 0x1af   : > { %v3513_v24 = vadd.f32 %v1762_v23, %v1698_v15  ;;  %v1635_v25 = vpop.f32.mrf.mxu1  ;;  %v1415_v15 = vld [vmem:[%s3982_s1 + $0x3e0] sm:$0xff]  ;;  %v1084_v23 = vld [vmem:[%s3050_s29 + $0x508] sm:$0xff] }
 0x1b0   : > { %1829 = vmatmul.f32.gmra.mxu0 %v1379_v20  ;;  %1959 = vmatmul.f32.gmra.mxu2 %v1381_v21  ;;  %v1636_v31 = vadd.f32 %v1635_v25, %v1570_v19  ;;  %v1416_v21 = vld [vmem:[%s3982_s1 + $0x3e8] sm:$0xff]  ;;  %v1268_v25 = vmax.f32 %v1084_v23, 0.0 }
 0x1b2   : > { %1894 = vmatmul.f32.gmra.mxu1 %v1380_v26  ;;  %2196 = vmatpush.msra.mxu2 %v1268_v25 }
 0x1b3   : > { %2024 = vmatmul.f32.gmra.mxu3 %v1382_v27  ;;  %v1700_v32 = vpop.f32.mrf.mxu2 }
 0x1b4   : > { %v1701_v34 = vadd.f32 %v1700_v32, %v1636_v31  ;;  %v1236_v32 = vmax.f32 %v1052_v28, 0.0 }
 0x1b5   : > { %v1573_v37 = vpop.f32.mrf.mxu0 }
 0x1b6   : > { %v1765_v42 = vpop.f32.mrf.mxu3  ;;  %2066 = vmatpush.msra.mxu0 %v1236_v32 }
 0x1b7   : > { %v3530_v43 = vadd.f32 %v1765_v42, %v1701_v34  ;;  %v1638_v44 = vpop.f32.mrf.mxu1  ;;  %v1068_v34 = vld [vmem:[%s3050_s29 + $0x488] sm:$0xff] }
 0x1b8   : > { %1832 = vmatmul.f32.gmra.mxu0 %v1391_v38  ;;  %1962 = vmatmul.f32.gmra.mxu2 %v1393_v39  ;;  %v1639_v49 = vadd.f32 %v1638_v44, %v1573_v37  ;;  %v1429_v37 = vld [vmem:[%s3982_s1 + $0x450] sm:$0xff]  ;;  %v1252_v38 = vmax.f32 %v1068_v34, 0.0  ;;  %v1428_v44 = vld [vmem:[%s3982_s1 + $0x448] sm:$0xff] }
 0x1b9   : > { %v1477_v34 = vld [vmem:[%s3982_s1 + $0x5d0] sm:$0xff] }
 0x1ba   : > { %1897 = vmatmul.f32.gmra.mxu1 %v1392_v45  ;;  %v1430_v45 = vld [vmem:[%s3982_s1 + $0x458] sm:$0xff] }
 0x1bb   : > { %2027 = vmatmul.f32.gmra.mxu3 %v1394_v46  ;;  %v1703_v51 = vpop.f32.mrf.mxu2  ;;  %2131 = vmatpush.msra.mxu1 %v1252_v38  ;;  %v1083_v46 = vld [vmem:[%s3050_s29 + $0x500] sm:$0xff]  ;;  %v1476_v38 = vld [vmem:[%s3982_s1 + $0x5c8] sm:$0xff] }
 0x1bc   : > { %v1704_v54 = vadd.f32 %v1703_v51, %v1639_v49  ;;  %v1267_v47 = vmax.f32 %v1083_v46, 0.0  ;;  %v1051_v51 = vld [vmem:[%s3050_s29 + $0x400] sm:$0xff] }
 0x1bd   : > { %v1576_v59 = vpop.f32.mrf.mxu0  ;;  %v1235_v53 = vmax.f32 %v1051_v51, 0.0 }
 0x1be   : > { %v1768_v63 = vpop.f32.mrf.mxu3  ;;  %2197 = vmatpush.msra.mxu2 %v1267_v47  ;;  %v1299_v47 = vld [vmem:[%s3982_s1 + $0x40] sm:$0xff] }
 0x1bf   : > { %v3548_v0 = vadd.f32 %v1768_v63, %v1704_v54  ;;  %v1641_v1 = vpop.f32.mrf.mxu1  ;;  %v1067_v54 = vld [vmem:[%s3050_s29 + $0x480] sm:$0xff]  ;;  %2067 = vmatpush.msra.mxu0 %v1235_v53  ;;  %v1440_v63 = vld [vmem:[%s3982_s1 + $0x4a8] sm:$0xff] }
 0x1c0   : > { %1835 = vmatmul.f32.gmra.mxu0 %v1403_v60  ;;  %1965 = vmatmul.f32.gmra.mxu2 %v1405_v61  ;;  %v1642_v7 = vadd.f32 %v1641_v1, %v1576_v59  ;;  %v1251_v59 = vmax.f32 %v1067_v54, 0.0  ;;  %v1442_v1 = vld [vmem:[%s3982_s1 + $0x4b8] sm:$0xff]  ;;  %v1300_v54 = vld [vmem:[%s3982_s1 + $0x48] sm:$0xff] }
 0x1c2   : > { %1900 = vmatmul.f32.gmra.mxu1 %v1404_v2 }
 0x1c3   : > { %2030 = vmatmul.f32.gmra.mxu3 %v1406_v3  ;;  %v1706_v8 = vpop.f32.mrf.mxu2  ;;  %2132 = vmatpush.msra.mxu1 %v1251_v59 }
 0x1c4   : > { %v1707_v10 = vadd.f32 %v1706_v8, %v1642_v7  ;;  %v1451_v7 = vld [vmem:[%s3982_s1 + $0x500] sm:$0xff]  ;;  %v1453_v8 = vld [vmem:[%s3982_s1 + $0x510] sm:$0xff] }
 0x1c5   : > { %v1579_v14 = vpop.f32.mrf.mxu0 }
 0x1c6   : > { %v1771_v18 = vpop.f32.mrf.mxu3 }
 0x1c7   : > { %v3565_v19 = vadd.f32 %v1771_v18, %v1707_v10  ;;  %v1644_v20 = vpop.f32.mrf.mxu1 }
 0x1c8   : > { %1838 = vmatmul.f32.gmra.mxu0 %v1415_v15  ;;  %1968 = vmatmul.f32.gmra.mxu2 %v1417_v16  ;;  %v1645_v26 = vadd.f32 %v1644_v20, %v1579_v14  ;;  %v1454_v14 = vld [vmem:[%s3982_s1 + $0x518] sm:$0xff]  ;;  %v1463_v20 = vld [vmem:[%s3982_s1 + $0x560] sm:$0xff] }
 0x1ca   : > { %1903 = vmatmul.f32.gmra.mxu1 %v1416_v21  ;;  %v1465_v21 = vld [vmem:[%s3982_s1 + $0x570] sm:$0xff] }
 0x1cb   : > { %2033 = vmatmul.f32.gmra.mxu3 %v1418_v22  ;;  %v1709_v27 = vpop.f32.mrf.mxu2 }
 0x1cc   : > { %v1710_v31 = vadd.f32 %v1709_v27, %v1645_v26  ;;  %v1464_v26 = vld [vmem:[%s3982_s1 + $0x568] sm:$0xff]  ;;  %v1466_v27 = vld [vmem:[%s3982_s1 + $0x578] sm:$0xff] }
 0x1cd   : > { %v1582_v35 = vpop.f32.mrf.mxu0 }
 0x1ce   : > { %v1774_v39 = vpop.f32.mrf.mxu3 }
 0x1cf   : > { %v3583_v40 = vadd.f32 %v1774_v39, %v1710_v31  ;;  %v1647_v42 = vpop.f32.mrf.mxu1  ;;  %v1478_v39 = vld [vmem:[%s3982_s1 + $0x5d8] sm:$0xff] }
 0x1d0   : > { %1841 = vmatmul.f32.gmra.mxu0 %v1427_v36  ;;  %1971 = vmatmul.f32.gmra.mxu2 %v1429_v37  ;;  %v1648_v48 = vadd.f32 %v1647_v42, %v1582_v35 }
 0x1d2   : > { %1906 = vmatmul.f32.gmra.mxu1 %v1428_v44 }
 0x1d3   : > { %2036 = vmatmul.f32.gmra.mxu3 %v1430_v45  ;;  %v1712_v49 = vpop.f32.mrf.mxu2 }
 0x1d4   : > { %v1713_v52 = vadd.f32 %v1712_v49, %v1648_v48  ;;  %v1301_v48 = vld [vmem:[%s3982_s1 + $0x50] sm:$0xff] }
 0x1d5   : > { %v1585_v55 = vpop.f32.mrf.mxu0 }
 0x1d6   : > { %v1777_v60 = vpop.f32.mrf.mxu3 }
 0x1d7   : > { %v3600_v61 = vadd.f32 %v1777_v60, %v1713_v52  ;;  %v1650_v62 = vpop.f32.mrf.mxu1  ;;  %v1311_v60 = vld [vmem:[%s3982_s1 + $0xa0] sm:$0xff] }
 0x1d8   : > { %1844 = vmatmul.f32.gmra.mxu0 %v1439_v56  ;;  %1974 = vmatmul.f32.gmra.mxu2 %v1441_v57  ;;  %v1651_v2 = vadd.f32 %v1650_v62, %v1585_v55  ;;  %v1302_v55 = vld [vmem:[%s3982_s1 + $0x58] sm:$0xff]  ;;  %v1313_v62 = vld [vmem:[%s3982_s1 + $0xb0] sm:$0xff] }
 0x1da   : > { %1909 = vmatmul.f32.gmra.mxu1 %v1440_v63 }
 0x1db   : > { %2039 = vmatmul.f32.gmra.mxu3 %v1442_v1  ;;  %v1715_v3 = vpop.f32.mrf.mxu2 }
 0x1dc   : > { %v1716_v5 = vadd.f32 %v1715_v3, %v1651_v2 }
 0x1dd   : > { %v1588_v6 = vpop.f32.mrf.mxu0 }
 0x1de   : > { %v1780_v9 = vpop.f32.mrf.mxu3 }
 0x1df   : > { %v3614_v10 = vadd.f32 %v1780_v9, %v1716_v5  ;;  %v1653_v11 = vpop.f32.mrf.mxu1  ;;  %v1312_v5 = vld [vmem:[%s3982_s1 + $0xa8] sm:$0xff] }
 0x1e0   : > { %1847 = vmatmul.f32.gmra.mxu0 %v1451_v7  ;;  %1977 = vmatmul.f32.gmra.mxu2 %v1453_v8  ;;  %v1654_v15 = vadd.f32 %v1653_v11, %v1588_v6  ;;  %v1314_v6 = vld [vmem:[%s3982_s1 + $0xb8] sm:$0xff]  ;;  %v1323_v11 = vld [vmem:[%s3982_s1 + $0x100] sm:$0xff] }
 0x1e2   : > { %1912 = vmatmul.f32.gmra.mxu1 %v1452_v12  ;;  %v1325_v12 = vld [vmem:[%s3982_s1 + $0x110] sm:$0xff] }
 0x1e3   : > { %2042 = vmatmul.f32.gmra.mxu3 %v1454_v14  ;;  %v1718_v16 = vpop.f32.mrf.mxu2 }
 0x1e4   : > { %v1719_v17 = vadd.f32 %v1718_v16, %v1654_v15 }
 0x1e5   : > { %v1591_v18 = vpop.f32.mrf.mxu0 }
 0x1e6   : > { %v1783_v22 = vpop.f32.mrf.mxu3 }
 0x1e7   : > { %v3628_v23 = vadd.f32 %v1783_v22, %v1719_v17  ;;  %v1656_v25 = vpop.f32.mrf.mxu1 }
 0x1e8   : > { %1850 = vmatmul.f32.gmra.mxu0 %v1463_v20  ;;  %1980 = vmatmul.f32.gmra.mxu2 %v1465_v21  ;;  %v1657_v28 = vadd.f32 %v1656_v25, %v1591_v18  ;;  %v1324_v18 = vld [vmem:[%s3982_s1 + $0x108] sm:$0xff]  ;;  %v1326_v20 = vld [vmem:[%s3982_s1 + $0x118] sm:$0xff] }
 0x1ea   : > { %1915 = vmatmul.f32.gmra.mxu1 %v1464_v26  ;;  %v1335_v26 = vld [vmem:[%s3982_s1 + $0x160] sm:$0xff] }
 0x1eb   : > { %2045 = vmatmul.f32.gmra.mxu3 %v1466_v27  ;;  %v1721_v29 = vpop.f32.mrf.mxu2  ;;  %v1337_v27 = vld [vmem:[%s3982_s1 + $0x170] sm:$0xff] }
 0x1ec   : > { %v1722_v31 = vadd.f32 %v1721_v29, %v1657_v28 }
 0x1ed   : > { %v1594_v32 = vpop.f32.mrf.mxu0 }
 0x1ee   : > { %v1786_v35 = vpop.f32.mrf.mxu3 }
 0x1ef   : > { %v3642_v36 = vadd.f32 %v1786_v35, %v1722_v31  ;;  %v1659_v37 = vpop.f32.mrf.mxu1 }
 0x1f0   : > { %1853 = vmatmul.f32.gmra.mxu0 %v1475_v33  ;;  %1983 = vmatmul.f32.gmra.mxu2 %v1477_v34  ;;  %v1660_v42 = vadd.f32 %v1659_v37, %v1594_v32  ;;  %v1336_v33 = vld [vmem:[%s3982_s1 + $0x168] sm:$0xff]  ;;  %v1338_v34 = vld [vmem:[%s3982_s1 + $0x178] sm:$0xff] }
 0x1f2   : > { %1918 = vmatmul.f32.gmra.mxu1 %v1476_v38 }
 0x1f3   : > { %2048 = vmatmul.f32.gmra.mxu3 %v1478_v39  ;;  %v1724_v44 = vpop.f32.mrf.mxu2  ;;  %v1347_v39 = vld [vmem:[%s3982_s1 + $0x1c0] sm:$0xff] }
 0x1f4   : > { %v1725_v45 = vadd.f32 %v1724_v44, %v1660_v42  ;;  %v1349_v42 = vld [vmem:[%s3982_s1 + $0x1d0] sm:$0xff] }
 0x1f5   : > { %v1809_v46 = vpop.f32.mrf.mxu0 }
 0x1f6   : > { %v1789_v49 = vpop.f32.mrf.mxu3  ;;  %v1810_v51 = vadd.f32 %v1809_v46, %v3408_v41 }
 0x1f7   : > { %v3657_v52 = vadd.f32 %v1789_v49, %v1725_v45  ;;  %v1874_v53 = vpop.f32.mrf.mxu1  ;;  %v1350_v49 = vld [vmem:[%s3982_s1 + $0x1d8] sm:$0xff] }
 0x1f8   : > { %2068 = vmatmul.f32.vlgmr.msra.gmra.mxu0 %v1299_v47  ;;  %2198 = vmatmul.f32.vlgmr.msra.gmra.mxu2 %v1301_v48  ;;  %v1875_v56 = vadd.f32 %v1874_v53, %v1810_v51  ;;  %v1348_v48 = vld [vmem:[%s3982_s1 + $0x1c8] sm:$0xff] }
 0x1fa   : > { %2133 = vmatmul.f32.vlgmr.msra.gmra.mxu1 %v1300_v54 }
 0x1fb   : > { %2508 = vmatmul.msk.f32.vlgmr.msra.gmra.mxu3 %vm1483_vm0, %v1302_v55  ;;  %v1939_v57 = vpop.f32.mrf.mxu2  ;;  %v1359_v55 = vld [vmem:[%s3982_s1 + $0x220] sm:$0xff] }
 0x1fc   : > { %v1940_v41 = vadd.f32 %v1939_v57, %v1875_v56  ;;  %v1361_v56 = vld [vmem:[%s3982_s1 + $0x230] sm:$0xff] }
 0x1fd   : > { %v1812_v59 = vpop.f32.mrf.mxu0 }
 0x1fe   : > { %v1813_v63 = vadd.f32 %v1812_v59, %v3425_v58  ;;  %v2004_v1 = vpop.f32.mrf.mxu3 }
 0x1ff   : > { %v3673_v2 = vadd.f32 %v2004_v1, %v1940_v41  ;;  %v1877_v3 = vpop.f32.mrf.mxu1 }
 0x200   : > { %2071 = vmatmul.f32.gmra.mxu0 %v1311_v60  ;;  %2201 = vmatmul.f32.gmra.mxu2 %v1313_v62  ;;  %v1878_v7 = vadd.f32 %v1877_v3, %v1813_v63  ;;  %v1360_v62 = vld [vmem:[%s3982_s1 + $0x228] sm:$0xff]  ;;  %v1362_v63 = vld [vmem:[%s3982_s1 + $0x238] sm:$0xff] }
 0x202   : > { %2136 = vmatmul.f32.gmra.mxu1 %v1312_v5 }
 0x203   : > { %2509 = vmatmul.msk.f32.gmra.mxu3 %vm1483_vm0, %v1314_v6  ;;  %v1942_v8 = vpop.f32.mrf.mxu2  ;;  %v1371_v6 = vld [vmem:[%s3982_s1 + $0x280] sm:$0xff] }
 0x204   : > { %v1943_v58 = vadd.f32 %v1942_v8, %v1878_v7  ;;  %v1373_v7 = vld [vmem:[%s3982_s1 + $0x290] sm:$0xff] }
 0x205   : > { %v1815_v9 = vpop.f32.mrf.mxu0 }
 0x206   : > { %v1816_v14 = vadd.f32 %v1815_v9, %v3443_v13  ;;  %v2007_v15 = vpop.f32.mrf.mxu3 }
 0x207   : > { %v3689_v16 = vadd.f32 %v2007_v15, %v1943_v58  ;;  %v1880_v17 = vpop.f32.mrf.mxu1 }
 0x208   : > { %2074 = vmatmul.f32.gmra.mxu0 %v1323_v11  ;;  %2204 = vmatmul.f32.gmra.mxu2 %v1325_v12  ;;  %v1881_v21 = vadd.f32 %v1880_v17, %v1816_v14  ;;  %v1372_v12 = vld [vmem:[%s3982_s1 + $0x288] sm:$0xff]  ;;  %v1374_v14 = vld [vmem:[%s3982_s1 + $0x298] sm:$0xff] }
 0x20a   : > { %2139 = vmatmul.f32.gmra.mxu1 %v1324_v18 }
 0x20b   : > { %2510 = vmatmul.msk.f32.gmra.mxu3 %vm1483_vm0, %v1326_v20  ;;  %v1945_v22 = vpop.f32.mrf.mxu2  ;;  %v1383_v20 = vld [vmem:[%s3982_s1 + $0x2e0] sm:$0xff] }
 0x20c   : > { %v1946_v13 = vadd.f32 %v1945_v22, %v1881_v21  ;;  %v1385_v21 = vld [vmem:[%s3982_s1 + $0x2f0] sm:$0xff] }
 0x20d   : > { %v1818_v25 = vpop.f32.mrf.mxu0 }
 0x20e   : > { %v1819_v28 = vadd.f32 %v1818_v25, %v3460_v30  ;;  %v2010_v29 = vpop.f32.mrf.mxu3 }
 0x20f   : > { %v3705_v31 = vadd.f32 %v2010_v29, %v1946_v13  ;;  %v1883_v32 = vpop.f32.mrf.mxu1 }
 0x210   : > { %2077 = vmatmul.f32.gmra.mxu0 %v1335_v26  ;;  %2207 = vmatmul.f32.gmra.mxu2 %v1337_v27  ;;  %v1884_v35 = vadd.f32 %v1883_v32, %v1819_v28  ;;  %v1384_v27 = vld [vmem:[%s3982_s1 + $0x2e8] sm:$0xff]  ;;  %v1386_v28 = vld [vmem:[%s3982_s1 + $0x2f8] sm:$0xff] }
 0x212   : > { %2142 = vmatmul.f32.gmra.mxu1 %v1336_v33 }
 0x213   : > { %2511 = vmatmul.msk.f32.gmra.mxu3 %vm1483_vm0, %v1338_v34  ;;  %v1948_v37 = vpop.f32.mrf.mxu2  ;;  %v1395_v34 = vld [vmem:[%s3982_s1 + $0x340] sm:$0xff] }
 0x214   : > { %v1949_v30 = vadd.f32 %v1948_v37, %v1884_v35  ;;  %v1397_v35 = vld [vmem:[%s3982_s1 + $0x350] sm:$0xff] }
 0x215   : > { %v1821_v38 = vpop.f32.mrf.mxu0 }
 0x216   : > { %v1822_v44 = vadd.f32 %v1821_v38, %v3478_v50  ;;  %v2013_v45 = vpop.f32.mrf.mxu3 }
 0x217   : > { %v3721_v46 = vadd.f32 %v2013_v45, %v1949_v30  ;;  %v1886_v47 = vpop.f32.mrf.mxu1  ;;  %v1398_v45 = vld [vmem:[%s3982_s1 + $0x358] sm:$0xff] }
 0x218   : > { %2080 = vmatmul.f32.gmra.mxu0 %v1347_v39  ;;  %2210 = vmatmul.f32.gmra.mxu2 %v1349_v42  ;;  %v1887_v51 = vadd.f32 %v1886_v47, %v1822_v44  ;;  %v1396_v42 = vld [vmem:[%s3982_s1 + $0x348] sm:$0xff] }
 0x21a   : > { %2145 = vmatmul.f32.gmra.mxu1 %v1348_v48 }
 0x21b   : > { %2512 = vmatmul.msk.f32.gmra.mxu3 %vm1483_vm0, %v1350_v49  ;;  %v1951_v53 = vpop.f32.mrf.mxu2  ;;  %v1407_v49 = vld [vmem:[%s3982_s1 + $0x3a0] sm:$0xff] }
 0x21c   : > { %v1952_v50 = vadd.f32 %v1951_v53, %v1887_v51  ;;  %v1409_v51 = vld [vmem:[%s3982_s1 + $0x3b0] sm:$0xff] }
 0x21d   : > { %v1824_v54 = vpop.f32.mrf.mxu0 }
 0x21e   : > { %v1825_v57 = vadd.f32 %v1824_v54, %v3495_v4  ;;  %v2016_v41 = vpop.f32.mrf.mxu3 }
 0x21f   : > { %v3737_v59 = vadd.f32 %v2016_v41, %v1952_v50  ;;  %v1889_v60 = vpop.f32.mrf.mxu1  ;;  %v1410_v41 = vld [vmem:[%s3982_s1 + $0x3b8] sm:$0xff] }
 0x220   : > { %2083 = vmatmul.f32.gmra.mxu0 %v1359_v55  ;;  %2213 = vmatmul.f32.gmra.mxu2 %v1361_v56  ;;  %v1890_v1 = vadd.f32 %v1889_v60, %v1825_v57  ;;  %v1408_v56 = vld [vmem:[%s3982_s1 + $0x3a8] sm:$0xff] }
 0x222   : > { %2148 = vmatmul.f32.gmra.mxu1 %v1360_v62 }
 0x223   : > { %2513 = vmatmul.msk.f32.gmra.mxu3 %vm1483_vm0, %v1362_v63  ;;  %v1954_v3 = vpop.f32.mrf.mxu2  ;;  %v1419_v63 = vld [vmem:[%s3982_s1 + $0x400] sm:$0xff] }
 0x224   : > { %v1955_v4 = vadd.f32 %v1954_v3, %v1890_v1  ;;  %v1421_v1 = vld [vmem:[%s3982_s1 + $0x410] sm:$0xff] }
 0x225   : > { %v1827_v5 = vpop.f32.mrf.mxu0 }
 0x226   : > { %v1828_v8 = vadd.f32 %v1827_v5, %v3513_v24  ;;  %v2019_v58 = vpop.f32.mrf.mxu3 }
 0x227   : > { %v3753_v9 = vadd.f32 %v2019_v58, %v1955_v4  ;;  %v1892_v11 = vpop.f32.mrf.mxu1  ;;  %v1422_v58 = vld [vmem:[%s3982_s1 + $0x418] sm:$0xff] }
 0x228   : > { %2086 = vmatmul.f32.gmra.mxu0 %v1371_v6  ;;  %2216 = vmatmul.f32.gmra.mxu2 %v1373_v7  ;;  %v1893_v15 = vadd.f32 %v1892_v11, %v1828_v8  ;;  %v1420_v7 = vld [vmem:[%s3982_s1 + $0x408] sm:$0xff] }
 0x22a   : > { %2151 = vmatmul.f32.gmra.mxu1 %v1372_v12 }
 0x22b   : > { %2514 = vmatmul.msk.f32.gmra.mxu3 %vm1483_vm0, %v1374_v14  ;;  %v1957_v17 = vpop.f32.mrf.mxu2  ;;  %v1431_v14 = vld [vmem:[%s3982_s1 + $0x460] sm:$0xff] }
 0x22c   : > { %v1958_v24 = vadd.f32 %v1957_v17, %v1893_v15  ;;  %v1433_v15 = vld [vmem:[%s3982_s1 + $0x470] sm:$0xff] }
 0x22d   : > { %v1830_v18 = vpop.f32.mrf.mxu0 }
 0x22e   : > { %v1831_v22 = vadd.f32 %v1830_v18, %v3530_v43  ;;  %v2022_v13 = vpop.f32.mrf.mxu3 }
 0x22f   : > { %v3769_v25 = vadd.f32 %v2022_v13, %v1958_v24  ;;  %v1895_v26 = vpop.f32.mrf.mxu1  ;;  %v1434_v13 = vld [vmem:[%s3982_s1 + $0x478] sm:$0xff] }
 0x230   : > { %2089 = vmatmul.f32.gmra.mxu0 %v1383_v20  ;;  %2219 = vmatmul.f32.gmra.mxu2 %v1385_v21  ;;  %v1896_v29 = vadd.f32 %v1895_v26, %v1831_v22  ;;  %v1432_v21 = vld [vmem:[%s3982_s1 + $0x468] sm:$0xff] }
 0x232   : > { %2154 = vmatmul.f32.gmra.mxu1 %v1384_v27 }
 0x233   : > { %2515 = vmatmul.msk.f32.gmra.mxu3 %vm1483_vm0, %v1386_v28  ;;  %v1960_v32 = vpop.f32.mrf.mxu2  ;;  %v1443_v28 = vld [vmem:[%s3982_s1 + $0x4c0] sm:$0xff] }
 0x234   : > { %v1961_v43 = vadd.f32 %v1960_v32, %v1896_v29  ;;  %v1445_v29 = vld [vmem:[%s3982_s1 + $0x4d0] sm:$0xff] }
 0x235   : > { %v1833_v33 = vpop.f32.mrf.mxu0 }
 0x236   : > { %v1834_v37 = vadd.f32 %v1833_v33, %v3548_v0  ;;  %v2025_v30 = vpop.f32.mrf.mxu3 }
 0x237   : > { %v3785_v38 = vadd.f32 %v2025_v30, %v1961_v43  ;;  %v1898_v39 = vpop.f32.mrf.mxu1  ;;  %v1446_v30 = vld [vmem:[%s3982_s1 + $0x4d8] sm:$0xff] }
 0x238   : > { %v1899_v44 = vadd.f32 %v1898_v39, %v1834_v37  ;;  %2092 = vmatmul.f32.gmra.mxu0 %v1395_v34  ;;  %2222 = vmatmul.f32.gmra.mxu2 %v1397_v35  ;;  %v1444_v35 = vld [vmem:[%s3982_s1 + $0x4c8] sm:$0xff] }
 0x23a   : > { %2157 = vmatmul.f32.gmra.mxu1 %v1396_v42 }
 0x23b   : > { %2516 = vmatmul.msk.f32.gmra.mxu3 %vm1483_vm0, %v1398_v45  ;;  %v1963_v47 = vpop.f32.mrf.mxu2  ;;  %v1457_v45 = vld [vmem:[%s3982_s1 + $0x530] sm:$0xff] }
 0x23c   : > { %v1964_v0 = vadd.f32 %v1963_v47, %v1899_v44  ;;  %v1455_v44 = vld [vmem:[%s3982_s1 + $0x520] sm:$0xff] }
 0x23d   : > { %v1836_v48 = vpop.f32.mrf.mxu0 }
 0x23e   : > { %v1837_v53 = vadd.f32 %v1836_v48, %v3565_v19  ;;  %v2028_v50 = vpop.f32.mrf.mxu3 }
 0x23f   : > { %v3801_v54 = vadd.f32 %v2028_v50, %v1964_v0  ;;  %v1901_v55 = vpop.f32.mrf.mxu1  ;;  %v1458_v50 = vld [vmem:[%s3982_s1 + $0x538] sm:$0xff] }
 0x240   : > { %v1902_v57 = vadd.f32 %v1901_v55, %v1837_v53  ;;  %2095 = vmatmul.f32.gmra.mxu0 %v1407_v49  ;;  %2225 = vmatmul.f32.gmra.mxu2 %v1409_v51  ;;  %v1456_v51 = vld [vmem:[%s3982_s1 + $0x528] sm:$0xff] }
 0x242   : > { %2160 = vmatmul.f32.gmra.mxu1 %v1408_v56 }
 0x243   : > { %2517 = vmatmul.msk.f32.gmra.mxu3 %vm1483_vm0, %v1410_v41  ;;  %v1966_v60 = vpop.f32.mrf.mxu2  ;;  %v1469_v41 = vld [vmem:[%s3982_s1 + $0x590] sm:$0xff] }
 0x244   : > { %v1967_v19 = vadd.f32 %v1966_v60, %v1902_v57  ;;  %v1467_v57 = vld [vmem:[%s3982_s1 + $0x580] sm:$0xff] }
 0x245   : > { %v1839_v62 = vpop.f32.mrf.mxu0 }
 0x246   : > { %v1840_v3 = vadd.f32 %v1839_v62, %v3583_v40  ;;  %v2031_v4 = vpop.f32.mrf.mxu3 }
 0x247   : > { %v3817_v5 = vadd.f32 %v2031_v4, %v1967_v19  ;;  %v1904_v6 = vpop.f32.mrf.mxu1  ;;  %v1470_v4 = vld [vmem:[%s3982_s1 + $0x598] sm:$0xff] }
 0x248   : > { %v1905_v8 = vadd.f32 %v1904_v6, %v1840_v3  ;;  %2098 = vmatmul.f32.gmra.mxu0 %v1419_v63  ;;  %2228 = vmatmul.f32.gmra.mxu2 %v1421_v1  ;;  %v1468_v1 = vld [vmem:[%s3982_s1 + $0x588] sm:$0xff] }
 0x24a   : > { %2163 = vmatmul.f32.gmra.mxu1 %v1420_v7 }
 0x24b   : > { %2518 = vmatmul.msk.f32.gmra.mxu3 %vm1483_vm0, %v1422_v58  ;;  %v1969_v11 = vpop.f32.mrf.mxu2  ;;  %v1481_v58 = vld [vmem:[%s3982_s1 + $0x5f0] sm:$0xff] }
 0x24c   : > { %v1970_v40 = vadd.f32 %v1969_v11, %v1905_v8  ;;  %v1479_v8 = vld [vmem:[%s3982_s1 + $0x5e0] sm:$0xff] }
 0x24d   : > { %v1842_v12 = vpop.f32.mrf.mxu0 }
 0x24e   : > { %v1843_v17 = vadd.f32 %v1842_v12, %v3600_v61  ;;  %v2034_v24 = vpop.f32.mrf.mxu3 }
 0x24f   : > { %v3833_v18 = vadd.f32 %v2034_v24, %v1970_v40  ;;  %v1907_v20 = vpop.f32.mrf.mxu1  ;;  %v1482_v24 = vld [vmem:[%s3982_s1 + $0x5f8] sm:$0xff] }
 0x250   : > { %v1908_v22 = vadd.f32 %v1907_v20, %v1843_v17  ;;  %2101 = vmatmul.f32.gmra.mxu0 %v1431_v14  ;;  %2231 = vmatmul.f32.gmra.mxu2 %v1433_v15  ;;  %v1480_v15 = vld [vmem:[%s3982_s1 + $0x5e8] sm:$0xff] }
 0x252   : > { %2166 = vmatmul.f32.gmra.mxu1 %v1432_v21 }
 0x253   : > { %2519 = vmatmul.msk.f32.gmra.mxu3 %vm1483_vm0, %v1434_v13  ;;  %v1972_v26 = vpop.f32.mrf.mxu2 }
 0x254   : > { %v1973_v61 = vadd.f32 %v1972_v26, %v1908_v22 }
 0x255   : > { %v1845_v27 = vpop.f32.mrf.mxu0 }
 0x256   : > { %v1846_v32 = vadd.f32 %v1845_v27, %v3614_v10  ;;  %v2037_v43 = vpop.f32.mrf.mxu3 }
 0x257   : > { %v3849_v33 = vadd.f32 %v2037_v43, %v1973_v61  ;;  %v1910_v34 = vpop.f32.mrf.mxu1 }
 0x258   : > { %v1911_v37 = vadd.f32 %v1910_v34, %v1846_v32  ;;  %2104 = vmatmul.f32.gmra.mxu0 %v1443_v28  ;;  %2234 = vmatmul.f32.gmra.mxu2 %v1445_v29 }
 0x25a   : > { %2169 = vmatmul.f32.gmra.mxu1 %v1444_v35 }
 0x25b   : > { %2520 = vmatmul.msk.f32.gmra.mxu3 %vm1483_vm0, %v1446_v30  ;;  %v1975_v39 = vpop.f32.mrf.mxu2 }
 0x25c   : > { %v1976_v10 = vadd.f32 %v1975_v39, %v1911_v37 }
 0x25d   : > { %v1848_v42 = vpop.f32.mrf.mxu0 }
 0x25e   : > { %v1849_v47 = vadd.f32 %v1848_v42, %v3628_v23  ;;  %v2040_v0 = vpop.f32.mrf.mxu3 }
 0x25f   : > { %v3865_v48 = vadd.f32 %v2040_v0, %v1976_v10  ;;  %v1913_v49 = vpop.f32.mrf.mxu1 }
 0x260   : > { %v1914_v53 = vadd.f32 %v1913_v49, %v1849_v47  ;;  %2107 = vmatmul.f32.gmra.mxu0 %v1455_v44  ;;  %2237 = vmatmul.f32.gmra.mxu2 %v1457_v45 }
 0x262   : > { %2172 = vmatmul.f32.gmra.mxu1 %v1456_v51 }
 0x263   : > { %2521 = vmatmul.msk.f32.gmra.mxu3 %vm1483_vm0, %v1458_v50  ;;  %v1978_v55 = vpop.f32.mrf.mxu2 }
 0x264   : > { %v1979_v23 = vadd.f32 %v1978_v55, %v1914_v53 }
 0x265   : > { %v1851_v56 = vpop.f32.mrf.mxu0 }
 0x266   : > { %v1852_v60 = vadd.f32 %v1851_v56, %v3642_v36  ;;  %v2043_v19 = vpop.f32.mrf.mxu3 }
 0x267   : > { %v3881_v62 = vadd.f32 %v2043_v19, %v1979_v23  ;;  %v1916_v63 = vpop.f32.mrf.mxu1 }
 0x268   : > { %v1917_v3 = vadd.f32 %v1916_v63, %v1852_v60  ;;  %2110 = vmatmul.f32.gmra.mxu0 %v1467_v57  ;;  %2240 = vmatmul.f32.gmra.mxu2 %v1469_v41 }
 0x26a   : > { %2175 = vmatmul.f32.gmra.mxu1 %v1468_v1 }
 0x26b   : > { %2522 = vmatmul.msk.f32.gmra.mxu3 %vm1483_vm0, %v1470_v4  ;;  %v1981_v6 = vpop.f32.mrf.mxu2 }
 0x26c   : > { %v1982_v36 = vadd.f32 %v1981_v6, %v1917_v3 }
 0x26d   : > { %v1854_v7 = vpop.f32.mrf.mxu0 }
 0x26e   : > { %v1855_v11 = vadd.f32 %v1854_v7, %v3657_v52  ;;  %v2046_v40 = vpop.f32.mrf.mxu3 }
 0x26f   : > { %v3897_v12 = vadd.f32 %v2046_v40, %v1982_v36  ;;  %v1919_v14 = vpop.f32.mrf.mxu1 }
 0x270   : > { %v1920_v17 = vadd.f32 %v1919_v14, %v1855_v11  ;;  %2113 = vmatmul.f32.gmra.mxu0 %v1479_v8  ;;  %2243 = vmatmul.f32.gmra.mxu2 %v1481_v58 }
 0x272   : > { %2178 = vmatmul.f32.gmra.mxu1 %v1480_v15 }
 0x273   : > { %2523 = vmatmul.msk.f32.gmra.mxu3 %vm1483_vm0, %v1482_v24  ;;  %v1984_v52 = vpop.f32.mrf.mxu2 }
 0x274   : > { %v1985_v20 = vadd.f32 %v1984_v52, %v1920_v17 }
 0x275   : > { %v2069_v21 = vpop.f32.mrf.mxu0 }
 0x276   : > { %v2049_v22 = vpop.f32.mrf.mxu3  ;;  %v2070_v13 = vadd.f32 %v2069_v21, %v3673_v2 }
 0x277   : > { %v3907_v26 = vadd.f32 %v2049_v22, %v1985_v20  ;;  %v2134_v61 = vpop.f32.mrf.mxu1 }
 0x278   : > { %v2135_v27 = vadd.f32 %v2134_v61, %v2070_v13 }
 0x27b   : > { %v2199_v28 = vpop.f32.mrf.mxu2 }
 0x27c   : > { %v2200_v29 = vadd.f32 %v2199_v28, %v2135_v27 }
 0x27d   : > { %v2072_v32 = vpop.f32.mrf.mxu0 }
 0x27e   : > { %v2073_v43 = vadd.f32 %v2072_v32, %v3689_v16  ;;  %v2264_v34 = vpop.f32.mrf.mxu3 }
 0x27f   : > { %v2265_v35 = vadd.f32 %v2264_v34, %v2200_v29  ;;  %v2137_v37 = vpop.f32.mrf.mxu1 }
 0x280   : > { %v2138_v2 = vadd.f32 %v2137_v37, %v2073_v43 }
 0x281   : > { %2312 = vst [vmem:[%s3912_s26] sm:$0xff] %v2265_v35 }
 0x283   : > { %v2202_v30 = vpop.f32.mrf.mxu2 }
 0x284   : > { %v2203_v39 = vadd.f32 %v2202_v30, %v2138_v2 }
 0x285   : > { %v2075_v10 = vpop.f32.mrf.mxu0 }
 0x286   : > { %v2076_v42 = vadd.f32 %v2075_v10, %v3705_v31  ;;  %v2267_v44 = vpop.f32.mrf.mxu3 }
 0x287   : > { %v2268_v45 = vadd.f32 %v2267_v44, %v2203_v39  ;;  %v2140_v47 = vpop.f32.mrf.mxu1 }
 0x288   : > { %v2141_v16 = vadd.f32 %v2140_v47, %v2076_v42 }
 0x289   : > { %2313 = vst [vmem:[%s3912_s26 + $0x8] sm:$0xff] %v2268_v45 }
 0x28b   : > { %v2205_v0 = vpop.f32.mrf.mxu2 }
 0x28c   : > { %v2206_v49 = vadd.f32 %v2205_v0, %v2141_v16 }
 0x28d   : > { %v2078_v51 = vpop.f32.mrf.mxu0 }
 0x28e   : > { %v2079_v53 = vadd.f32 %v2078_v51, %v3721_v46  ;;  %v2270_v50 = vpop.f32.mrf.mxu3 }
 0x28f   : > { %v2271_v55 = vadd.f32 %v2270_v50, %v2206_v49  ;;  %v2143_v23 = vpop.f32.mrf.mxu1 }
 0x290   : > { %v2144_v56 = vadd.f32 %v2143_v23, %v2079_v53 }
 0x291   : > { %2314 = vst [vmem:[%s3912_s26 + $0x10] sm:$0xff] %v2271_v55 }
 0x293   : > { %v2208_v57 = vpop.f32.mrf.mxu2 }
 0x294   : > { %v2209_v41 = vadd.f32 %v2208_v57, %v2144_v56 }
 0x295   : > { %v2081_v31 = vpop.f32.mrf.mxu0 }
 0x296   : > { %v2082_v60 = vadd.f32 %v2081_v31, %v3737_v59  ;;  %v2273_v19 = vpop.f32.mrf.mxu3 }
 0x297   : > { %v2274_v63 = vadd.f32 %v2273_v19, %v2209_v41  ;;  %v2146_v1 = vpop.f32.mrf.mxu1 }
 0x298   : > { %v2147_v3 = vadd.f32 %v2146_v1, %v2082_v60 }
 0x299   : > { %2315 = vst [vmem:[%s3912_s26 + $0x18] sm:$0xff] %v2274_v63 }
 0x29b   : > { %v2211_v4 = vpop.f32.mrf.mxu2 }
 0x29c   : > { %v2212_v6 = vadd.f32 %v2211_v4, %v2147_v3 }
 0x29d   : > { %v2084_v46 = vpop.f32.mrf.mxu0 }
 0x29e   : > { %v2085_v36 = vadd.f32 %v2084_v46, %v3753_v9  ;;  %v2276_v7 = vpop.f32.mrf.mxu3 }
 0x29f   : > { %v2277_v8 = vadd.f32 %v2276_v7, %v2212_v6  ;;  %v2149_v58 = vpop.f32.mrf.mxu1 }
 0x2a0   : > { %v2150_v11 = vadd.f32 %v2149_v58, %v2085_v36 }
 0x2a1   : > { %2316 = vst [vmem:[%s3912_s26 + $0x20] sm:$0xff] %v2277_v8 }
 0x2a3   : > { %v2214_v40 = vpop.f32.mrf.mxu2 }
 0x2a4   : > { %v2215_v14 = vadd.f32 %v2214_v40, %v2150_v11 }
 0x2a5   : > { %v2087_v59 = vpop.f32.mrf.mxu0 }
 0x2a6   : > { %v2088_v15 = vadd.f32 %v2087_v59, %v3769_v25  ;;  %v2279_v17 = vpop.f32.mrf.mxu3 }
 0x2a7   : > { %v2280_v24 = vadd.f32 %v2279_v17, %v2215_v14  ;;  %v2152_v52 = vpop.f32.mrf.mxu1 }
 0x2a8   : > { %v2153_v20 = vadd.f32 %v2152_v52, %v2088_v15 }
 0x2a9   : > { %2317 = vst [vmem:[%s3912_s26 + $0x28] sm:$0xff] %v2280_v24 }
 0x2ab   : > { %v2217_v21 = vpop.f32.mrf.mxu2 }
 0x2ac   : > { %v2218_v22 = vadd.f32 %v2217_v21, %v2153_v20 }
 0x2ad   : > { %v2090_v9 = vpop.f32.mrf.mxu0 }
 0x2ae   : > { %v2091_v13 = vadd.f32 %v2090_v9, %v3785_v38  ;;  %v2282_v61 = vpop.f32.mrf.mxu3 }
 0x2af   : > { %v2283_v27 = vadd.f32 %v2282_v61, %v2218_v22  ;;  %v2155_v28 = vpop.f32.mrf.mxu1 }
 0x2b0   : > { %v2156_v29 = vadd.f32 %v2155_v28, %v2091_v13 }
 0x2b1   : > { %2318 = vst [vmem:[%s3912_s26 + $0x30] sm:$0xff] %v2283_v27 }
 0x2b3   : > { %v2220_v32 = vpop.f32.mrf.mxu2 }
 0x2b4   : > { %v2221_v43 = vadd.f32 %v2220_v32, %v2156_v29 }
 0x2b5   : > { %v2093_v25 = vpop.f32.mrf.mxu0 }
 0x2b6   : > { %v2094_v34 = vadd.f32 %v2093_v25, %v3801_v54  ;;  %v2285_v35 = vpop.f32.mrf.mxu3 }
 0x2b7   : > { %v2286_v37 = vadd.f32 %v2285_v35, %v2221_v43  ;;  %v2158_v2 = vpop.f32.mrf.mxu1 }
 0x2b8   : > { %v2159_v30 = vadd.f32 %v2158_v2, %v2094_v34  ;;  %v2401_v2 = vld [vmem:[%s3912_s26 + $0x10] sm:$0xff] (%p2660_p6) }
 0x2b9   : > { %2319 = vst [vmem:[%s3912_s26 + $0x38] sm:$0xff] %v2286_v37  ;;  %v2399_v37 = vld [vmem:[%s3912_s26 + $0x8] sm:$0xff] (%p2660_p6) }
 0x2ba   : > { %2400 = vst [vmem:[%s2338_s30 + $0x10] sm:$0xff] (%p2660_p6), %v2399_v37 }
 0x2bb   : > { %v2223_v39 = vpop.f32.mrf.mxu2  ;;  %2402 = vst [vmem:[%s2338_s30 + $0x20] sm:$0xff] (%p2660_p6), %v2401_v2 }
 0x2bc   : > { %v2224_v10 = vadd.f32 %v2223_v39, %v2159_v30  ;;  %v2403_v30 = vld [vmem:[%s3912_s26 + $0x18] sm:$0xff] (%p2660_p6)  ;;  %v2405_v39 = vld [vmem:[%s3912_s26 + $0x20] sm:$0xff] (%p2660_p6) }
 0x2bd   : > { %v2096_v38 = vpop.f32.mrf.mxu0  ;;  %2404 = vst [vmem:[%s2338_s30 + $0x30] sm:$0xff] (%p2660_p6), %v2403_v30 }
 0x2be   : > { %v2097_v42 = vadd.f32 %v2096_v38, %v3817_v5  ;;  %v2288_v44 = vpop.f32.mrf.mxu3  ;;  %v2409_v38 = vld [vmem:[%s3912_s26 + $0x30] sm:$0xff] (%p2660_p6)  ;;  %2406 = vst [vmem:[%s2338_s30 + $0x40] sm:$0xff] (%p2660_p6), %v2405_v39 }
 0x2bf   : > { %v2289_v45 = vadd.f32 %v2288_v44, %v2224_v10  ;;  %v2161_v47 = vpop.f32.mrf.mxu1  ;;  %v2407_v10 = vld [vmem:[%s3912_s26 + $0x28] sm:$0xff] (%p2660_p6)  ;;  %2410 = vst [vmem:[%s2338_s30 + $0x60] sm:$0xff] (%p2660_p6), %v2409_v38 }
 0x2c0   : > { %v2162_v16 = vadd.f32 %v2161_v47, %v2097_v42  ;;  %v2411_v42 = vld [vmem:[%s3912_s26 + $0x38] sm:$0xff] (%p2660_p6)  ;;  %2408 = vst [vmem:[%s2338_s30 + $0x50] sm:$0xff] (%p2660_p6), %v2407_v10 }
 0x2c1   : > { %2320 = vst [vmem:[%s3912_s26 + $0x40] sm:$0xff] %v2289_v45 }
 0x2c2   : > { %2412 = vst [vmem:[%s2338_s30 + $0x70] sm:$0xff] (%p2660_p6), %v2411_v42 }
 0x2c3   : > { %v2226_v0 = vpop.f32.mrf.mxu2 }
 0x2c4   : > { %v2227_v49 = vadd.f32 %v2226_v0, %v2162_v16 }
 0x2c5   : > { %v2099_v54 = vpop.f32.mrf.mxu0 }
 0x2c6   : > { %v2100_v51 = vadd.f32 %v2099_v54, %v3833_v18  ;;  %v2291_v53 = vpop.f32.mrf.mxu3 }
 0x2c7   : > { %v2292_v50 = vadd.f32 %v2291_v53, %v2227_v49  ;;  %v2164_v55 = vpop.f32.mrf.mxu1 }
 0x2c8   : > { %v2165_v23 = vadd.f32 %v2164_v55, %v2100_v51  ;;  %v2413_v44 = vld [vmem:[%s3912_s26 + $0x40] sm:$0xff] (%p2660_p6) }
 0x2c9   : > { %2321 = vst [vmem:[%s3912_s26 + $0x48] sm:$0xff] %v2292_v50 }
 0x2ca   : > { %2414 = vst [vmem:[%s2338_s30 + $0x80] sm:$0xff] (%p2660_p6), %v2413_v44 }
 0x2cb   : > { %v2229_v56 = vpop.f32.mrf.mxu2 }
 0x2cc   : > { %v2230_v57 = vadd.f32 %v2229_v56, %v2165_v23 }
 0x2cd   : > { %v2102_v5 = vpop.f32.mrf.mxu0 }
 0x2ce   : > { %v2103_v41 = vadd.f32 %v2102_v5, %v3849_v33  ;;  %v2294_v31 = vpop.f32.mrf.mxu3 }
 0x2cf   : > { %v2295_v60 = vadd.f32 %v2294_v31, %v2230_v57  ;;  %v2167_v19 = vpop.f32.mrf.mxu1 }
 0x2d0   : > { %v2168_v63 = vadd.f32 %v2167_v19, %v2103_v41  ;;  %v2415_v45 = vld [vmem:[%s3912_s26 + $0x48] sm:$0xff] (%p2660_p6) }
 0x2d1   : > { %2322 = vst [vmem:[%s3912_s26 + $0x50] sm:$0xff] %v2295_v60 }
 0x2d2   : > { %2416 = vst [vmem:[%s2338_s30 + $0x90] sm:$0xff] (%p2660_p6), %v2415_v45 }
 0x2d3   : > { %v2232_v1 = vpop.f32.mrf.mxu2 }
 0x2d4   : > { %v2233_v3 = vadd.f32 %v2232_v1, %v2168_v63 }
 0x2d5   : > { %v2105_v18 = vpop.f32.mrf.mxu0 }
 0x2d6   : > { %v2106_v4 = vadd.f32 %v2105_v18, %v3865_v48  ;;  %v2297_v6 = vpop.f32.mrf.mxu3 }
 0x2d7   : > { %v2298_v46 = vadd.f32 %v2297_v6, %v2233_v3  ;;  %v2170_v36 = vpop.f32.mrf.mxu1 }
 0x2d8   : > { %v2171_v7 = vadd.f32 %v2170_v36, %v2106_v4  ;;  %v2417_v47 = vld [vmem:[%s3912_s26 + $0x50] sm:$0xff] (%p2660_p6) }
 0x2d9   : > { %2323 = vst [vmem:[%s3912_s26 + $0x58] sm:$0xff] %v2298_v46 }
 0x2da   : > { %2418 = vst [vmem:[%s2338_s30 + $0xa0] sm:$0xff] (%p2660_p6), %v2417_v47 }
 0x2db   : > { %v2235_v8 = vpop.f32.mrf.mxu2 }
 0x2dc   : > { %v2236_v58 = vadd.f32 %v2235_v8, %v2171_v7 }
 0x2dd   : > { %v2108_v33 = vpop.f32.mrf.mxu0 }
 0x2de   : > { %v2109_v11 = vadd.f32 %v2108_v33, %v3881_v62  ;;  %v2300_v40 = vpop.f32.mrf.mxu3 }
 0x2df   : > { %v2301_v14 = vadd.f32 %v2300_v40, %v2236_v58  ;;  %v2173_v59 = vpop.f32.mrf.mxu1 }
 0x2e0   : > { %v2174_v15 = vadd.f32 %v2173_v59, %v2109_v11  ;;  %v2419_v16 = vld [vmem:[%s3912_s26 + $0x58] sm:$0xff] (%p2660_p6) }
 0x2e1   : > { %2324 = vst [vmem:[%s3912_s26 + $0x60] sm:$0xff] %v2301_v14 }
 0x2e2   : > { %2420 = vst [vmem:[%s2338_s30 + $0xb0] sm:$0xff] (%p2660_p6), %v2419_v16 }
 0x2e3   : > { %v2238_v17 = vpop.f32.mrf.mxu2 }
 0x2e4   : > { %v2239_v24 = vadd.f32 %v2238_v17, %v2174_v15 }
 0x2e5   : > { %v2111_v48 = vpop.f32.mrf.mxu0 }
 0x2e6   : > { %v2112_v52 = vadd.f32 %v2111_v48, %v3897_v12  ;;  %v2303_v20 = vpop.f32.mrf.mxu3 }
 0x2e7   : > { %v2304_v21 = vadd.f32 %v2303_v20, %v2239_v24  ;;  %v2176_v22 = vpop.f32.mrf.mxu1 }
 0x2e8   : > { %v2177_v9 = vadd.f32 %v2176_v22, %v2112_v52  ;;  %v2421_v0 = vld [vmem:[%s3912_s26 + $0x60] sm:$0xff] (%p2660_p6) }
 0x2e9   : > { %2325 = vst [vmem:[%s3912_s26 + $0x68] sm:$0xff] %v2304_v21 }
 0x2ea   : > { %2422 = vst [vmem:[%s2338_s30 + $0xc0] sm:$0xff] (%p2660_p6), %v2421_v0 }
 0x2eb   : > { %v2241_v13 = vpop.f32.mrf.mxu2 }
 0x2ec   : > { %v2242_v61 = vadd.f32 %v2241_v13, %v2177_v9 }
 0x2ed   : > { %v2114_v62 = vpop.f32.mrf.mxu0 }
 0x2ee   : > { %v2115_v27 = vadd.f32 %v2114_v62, %v3907_v26  ;;  %v2306_v28 = vpop.f32.mrf.mxu3  ;;  %v2397_v26 = vld [vmem:[%s3912_s26] sm:$0xff] (%p2660_p6) }
 0x2ef   : > { %v2307_v29 = vadd.f32 %v2306_v28, %v2242_v61  ;;  %v2179_v32 = vpop.f32.mrf.mxu1  ;;  %2398 = vst [vmem:[%s2338_s30] sm:$0xff] (%p2660_p6), %v2397_v26 }
 0x2f0   : > { %v2180_v43 = vadd.f32 %v2179_v32, %v2115_v27  ;;  %v2423_v49 = vld [vmem:[%s3912_s26 + $0x68] sm:$0xff] (%p2660_p6) }
 0x2f1   : > { %2326 = vst [vmem:[%s3912_s26 + $0x70] sm:$0xff] %v2307_v29 }
 0x2f2   : > { %2424 = vst [vmem:[%s2338_s30 + $0xd0] sm:$0xff] (%p2660_p6), %v2423_v49 }
 0x2f3   : > { %v2244_v25 = vpop.f32.mrf.mxu2 }
 0x2f4   : > { %v2245_v34 = vadd.f32 %v2244_v25, %v2180_v43 }
 0x2f5   : > { %2334 = sbr.rel (!%p2660_p6) target bundleno = 770 (0x302), region = 70 }
 0x2f6   : > { %v2309_v35 = vpop.f32.mrf.mxu3 }
 0x2f7   : > { %v2310_v12 = vadd.f32 %v2309_v35, %v2245_v34 }
 0x2f8   : > { %v2425_v54 = vld [vmem:[%s3912_s26 + $0x70] sm:$0xff] (%p2660_p6) }
 0x2f9   : > { %2327 = vst [vmem:[%s3912_s26 + $0x78] sm:$0xff] %v2310_v12 }
 0x2fa   : > { %2426 = vst [vmem:[%s2338_s30 + $0xe0] sm:$0xff] %v2425_v54 }
 0x300   : > { %v2427_v51 = vld [vmem:[%s3912_s26 + $0x78] sm:$0xff] }
 0x301   : > { %2428 = vst [vmem:[%s2338_s30 + $0xf0] sm:$0xff] %v2427_v51 }
 0x302 PF: > { %s12_s13 = sadd.s32 1, %s2608_s13   ;;  %s3985_s9 = smov %s2596_s10 }
 0x303   : > { %p9_p11 = scmp.ge.s32.totalorder %s12_s13, 4   ;;  %s3986_s10 = smov %s2665_s19 }
 0x304   : > { %s3987_s11 = smov %s2604_s12  ;;  %s3988_s12 = smov %s3990_s14 }
 0x305   :  { %11 = sbr.rel (!%p9_p11) target bundleno = 3 (0x3), region = 139 }

</bundles_post_ra>
